<compile_context>
chip_gen: v5e
topology: v5e:2x2
jax: 0.10.0
libtpu: 0.0.40
codegen_flags: <defaults>
</compile_context>

<pallas_src>
import functools

import jax
import jax.numpy as jnp
from jax.experimental import pallas as pl
from jax.experimental.pallas import tpu as pltpu


# ----------------------------------------------------------------------------
# Fused Pallas kernel: stacked trunk + read-outs + head for Bt images per step.
# ----------------------------------------------------------------------------
def _fused_head_kernel(x_ref, xs_ref, ys_ref, spread_ref, betas_ref,
                       w_ref, b_ref, out_ref, *,
                       layers, n_res_blocks, num_classes, batch_tile,
                       spatial, scale_factor):
    C, Bt, S = num_classes, batch_tile, spatial
    L = Bt * S

    def affine(idx, h):
        off, rows, cols = layers[idx]               # static slab offsets
        w = w_ref[off:off + rows, 0:cols]
        t = b_ref[off:off + rows, 0:1]
        return jnp.dot(w, h, preferred_element_type=jnp.float32) + t

    x = x_ref[...]                                  # (Cin, L) channel-major

    # --- stacked residual trunk: all 3 branches in block-diagonal form -----
    h1 = jnp.maximum(affine(0, x), 0.0)             # (3*planes, L)
    xr = jnp.concatenate([x, x, x], axis=0)         # shared-input residual
    h = jnp.maximum(affine(1, h1) + xr, 0.0)        # (3*ch, L)
    for i in range(1, n_res_blocks):                # later blocks: residual=h
        h1 = jnp.maximum(affine(2 * i, h), 0.0)
        h = jnp.maximum(affine(2 * i + 1, h1) + h, 0.0)
    h = jnp.maximum(affine(2 * n_res_blocks, h), 0.0)   # fc: conv+BN+relu

    # --- per-branch 1x1 read-outs (weights zero-padded to stacked width) ---
    base = 2 * n_res_blocks + 1
    uv = affine(base, h)          # (C, L)
    aux = affine(base + 1, h)     # (C, L)
    dvec = affine(base + 2, h)    # (1, L); depth read-out (wd, bd) pre-folded

    # --- epilogue: per-image spatial softmax / soft-argmax / depth ---------
    spread = spread_ref[...]                        # (C, 1)
    betas = betas_ref[...]                          # (C, 1)
    uv_l = uv * spread                              # scaled UV logits
    at_l = uv_l + betas * (aux * spread - uv_l)     # scaled attention logits
    xs = xs_ref[...]                                # (1, L) x-coords per lane
    ys = ys_ref[...]
    lane = jax.lax.broadcasted_iota(jnp.int32, (C, L), 1)
    lane3 = jax.lax.broadcasted_iota(jnp.int32, (C, 3), 1)
    sf = scale_factor

    for b in range(Bt):            # static small loop; segment = image b lanes
        seg = (lane >= b * S) & (lane < (b + 1) * S)

        def seg_softmax(logits, seg=seg):
            zl = jnp.where(seg, logits, -jnp.inf)
            m = jnp.max(zl, axis=-1, keepdims=True)
            e = jnp.exp(zl - m)                     # exactly 0 outside segment
            s = jnp.sum(e, axis=-1, keepdims=True)
            return e * pl.reciprocal(s, approx=True)

        hmp = seg_softmax(uv_l)                               # (C, L)
        x0 = jnp.sum(hmp * xs, axis=-1, keepdims=True)        # (C, 1)
        y0 = jnp.sum(hmp * ys, axis=-1, keepdims=True)
        attn = seg_softmax(at_l)
        d0 = jnp.sum(attn * dvec, axis=-1, keepdims=True)     # (C, 1)

        out_b = jnp.where(lane3 == 0, x0 * sf,
                          jnp.where(lane3 == 1, y0 * sf, d0))
        out_ref[b] = out_b.astype(out_ref.dtype)


def _pick_batch_tile(B, S, max_lanes=512):
    """Batch tile Bt: B % Bt == 0, packed lane width legal for the BlockSpec
    (multiple of 128 or the full array), kept modest so the masked per-image
    epilogue stays cheap, and >=2 grid steps kept when possible (v7x)."""
    legal = [bt for bt in range(1, B + 1)
             if B % bt == 0 and (bt == B or (bt * S) % 128 == 0)]
    modest = [bt for bt in legal if bt * S <= max(max_lanes, S)]
    if not modest:
        return min(legal)
    bt = max(modest)
    if B // bt < 2:
        halves = [t for t in modest if B // t >= 2 and t * S >= 128]
        if halves:
            bt = max(halves)
    return bt


def estimation_head_forward(x_nchw, fused, scale_factor=2.0, batch_tile=None):
    """Full EstimationHead forward as one pallas_call.

    x_nchw: (B, Cin, H, W) float32.   fused: output of fuse_params().
    Returns UVD of shape (B, num_classes, 3).
    """
    B, Cin, H, W = x_nchw.shape
    S = H * W
    C = fused["num_classes"]
    Bt = batch_tile if batch_tile is not None else _pick_batch_tile(B, S)
    assert B % Bt == 0
    G = B // Bt
    L = Bt * S

    # channel-major, lane-packed over (batch, spatial): (Cin, B*S)
    x = jnp.transpose(x_nchw.reshape(B, Cin, S), (1, 0, 2)).reshape(Cin, B * S)
    xs = jnp.tile(fused["xs"], (1, Bt))                        # (1, L)
    ys = jnp.tile(fused["ys"], (1, Bt))

    kernel = functools.partial(
        _fused_head_kernel,
        layers=fused["layer_meta"],
        n_res_blocks=fused["n_res_blocks"],
        num_classes=C,
        batch_tile=Bt,
        spatial=S,
        scale_factor=float(scale_factor),
    )

    in_specs = [
        pl.BlockSpec((Cin, L), lambda g: (0, g)),              # x tile
        pl.BlockSpec(xs.shape, lambda g: (0, 0)),              # coords / params
        pl.BlockSpec(ys.shape, lambda g: (0, 0)),
        pl.BlockSpec(fused["spread"].shape, lambda g: (0, 0)),
        pl.BlockSpec(fused["betas"].shape, lambda g: (0, 0)),
        pl.BlockSpec(fused["w_slab"].shape, lambda g: (0, 0)),  # weight slab
        pl.BlockSpec(fused["b_slab"].shape, lambda g: (0, 0)),  # bias slab
    ]

    return pl.pallas_call(
        kernel,
        out_shape=jax.ShapeDtypeStruct((B, C, 3), jnp.float32),
        grid_spec=pltpu.PrefetchScalarGridSpec(
            num_scalar_prefetch=0,
            grid=(G,),
            in_specs=in_specs,
            out_specs=pl.BlockSpec((Bt, C, 3), lambda g: (g, 0, 0)),
        ),
        compiler_params=pltpu.CompilerParams(
            dimension_semantics=("parallel",)),
    )(x, xs, ys, fused["spread"], fused["betas"],
      fused["w_slab"], fused["b_slab"])


# ----------------------------------------------------------------------------
# Parameter initialization (deterministic, synthetic) + one-time fusion prep
# ----------------------------------------------------------------------------
def _init_conv(key, cin, cout):
    kw, kb = jax.random.split(key)
    w = jax.random.normal(kw, (cin, cout), jnp.float32) / jnp.sqrt(cin)
    b = 0.1 * jax.random.normal(kb, (cout,), jnp.float32)
    return w, b


def _init_bn(key, c):
    kg, kb, km, kv = jax.random.split(key, 4)
    gamma = 1.0 + 0.1 * jax.random.normal(kg, (c,), jnp.float32)
    beta = 0.1 * jax.random.normal(kb, (c,), jnp.float32)
    mean = 0.1 * jax.random.normal(km, (c,), jnp.float32)
    var = 1.0 + 0.1 * jnp.abs(jax.random.normal(kv, (c,), jnp.float32))
    return gamma, beta, mean, var


def _fold_bn(conv_b, gamma, beta, mean, var, eps=1e-5):
    scale = gamma / jnp.sqrt(var + eps)
    shift = (conv_b - mean) * scale + beta
    return scale.reshape(1, -1), shift.reshape(1, -1)


def _init_branch(key, cin, planes, nblocks, cout_final):
    """_make_residual(block,...) + _make_fc(ch,ch) + Conv2d(ch, cout, 1)."""
    ch = planes * 2
    assert cin == ch, "identity residual requires inplanes == planes * expansion"
    p = {"blocks": []}
    in_c = cin
    for _ in range(nblocks):
        key, k1, k2, k3, k4 = jax.random.split(key, 5)
        w1, b1 = _init_conv(k1, in_c, planes)
        s1, t1 = _fold_bn(b1, *_init_bn(k2, planes))
        w2, b2 = _init_conv(k3, planes, ch)
        s2, t2 = _fold_bn(b2, *_init_bn(k4, ch))
        p["blocks"].append(dict(w1=w1, s1=s1, t1=t1, w2=w2, s2=s2, t2=t2))
        in_c = ch
    key, kf1, kf2, kc = jax.random.split(key, 4)
    wf, bf = _init_conv(kf1, ch, ch)
    sf, tf = _fold_bn(bf, *_init_bn(kf2, ch))
    wc, bc = _init_conv(kc, ch, cout_final)
    p.update(wf=wf, sf=sf, tf=tf, wc=wc,
             sc=jnp.ones((1, cout_final), jnp.float32),
             tc=bc.reshape(1, -1))
    return p


def init_params(key, *, input_dim, depth_dim, num_classes,
                num_blocks, attention_num_blocks, H, W):
    planes = input_dim // 2
    k_uv, k_at, k_d, k_wd, k_bd = jax.random.split(key, 5)
    idx = jnp.arange(H * W)
    return {
        "num_classes": num_classes,
        "depth_dim": depth_dim,
        "uv": _init_branch(k_uv, input_dim, planes, num_blocks, num_classes),
        "attn": _init_branch(k_at, input_dim, planes, attention_num_blocks, num_classes),
        "depth": _init_branch(k_d, input_dim, planes, num_blocks, depth_dim),
        "spread": jnp.ones((num_classes, 1), jnp.float32),          # not trained
        "betas": 0.5 * jnp.ones((num_classes, 1), jnp.float32),     # Betas buffer
        "wd": jax.random.normal(k_wd, (depth_dim, 1), jnp.float32) / jnp.sqrt(depth_dim),
        "bd": 0.1 * jax.random.normal(k_bd, (1, 1), jnp.float32),
        "xs": (idx % W).astype(jnp.float32).reshape(1, H * W),      # GetValuesX
        "ys": (idx // W).astype(jnp.float32).reshape(1, H * W),     # GetValuesY
    }


def fuse_params(params):
    """One-time prep: fold eval-mode BN into conv weights, fold the depth
    read-out (wd, bd) into the depth branch's final conv, stack the three
    branches into one block-diagonal trunk, and pack all weights/biases into
    two VMEM slabs with 8-aligned static row offsets."""
    C = params["num_classes"]

    def layer(w, s, t):                 # -> (cout, cin) weight, (cout, 1) bias
        return (w * s).T, t.reshape(-1, 1)

    branches = [params["uv"], params["attn"], params["depth"]]   # fixed order
    mb = max(len(p["blocks"]) for p in branches)
    planes = branches[0]["blocks"][0]["w1"].shape[1]
    ch = branches[0]["blocks"][0]["w2"].shape[1]

    def blk_layer(p, i, which):
        if i < len(p["blocks"]):
            b = p["blocks"][i]
            if which == 1:
                return layer(b["w1"], b["s1"], b["t1"])
            return layer(b["w2"], b["s2"], b["t2"])
        # identity pad for shorter branches: zero conv + zero bias keeps the
        # running state unchanged through relu(0 + 0 + h) since h >= 0.
        if which == 1:
            return (jnp.zeros((planes, ch), jnp.float32),
                    jnp.zeros((planes, 1), jnp.float32))
        return (jnp.zeros((ch, planes), jnp.float32),
                jnp.zeros((ch, 1), jnp.float32))

    def block_diag(ms):
        rr = sum(m.shape[0] for m in ms)
        cc = sum(m.shape[1] for m in ms)
        out = jnp.zeros((rr, cc), jnp.float32)
        r = c = 0
        for m in ms:
            out = out.at[r:r + m.shape[0], c:c + m.shape[1]].set(m)
            r += m.shape[0]
            c += m.shape[1]
        return out

    stacked = []    # list of (W, t), trunk order then the three read-outs
    # block 0: conv1 is dense (all three branches read the same x)
    w1s, t1s = zip(*[blk_layer(p, 0, 1) for p in branches])
    stacked.append((jnp.concatenate(w1s, axis=0), jnp.concatenate(t1s, axis=0)))
    w2s, t2s = zip(*[blk_layer(p, 0, 2) for p in branches])
    stacked.append((block_diag(w2s), jnp.concatenate(t2s, axis=0)))
    # blocks 1..mb-1: fully block-diagonal (shorter branches zero-padded)
    for i in range(1, mb):
        w1s, t1s = zip(*[blk_layer(p, i, 1) for p in branches])
        stacked.append((block_diag(w1s), jnp.concatenate(t1s, axis=0)))
        w2s, t2s = zip(*[blk_layer(p, i, 2) for p in branches])
        stacked.append((block_diag(w2s), jnp.concatenate(t2s, axis=0)))
    # fc (conv + folded BN + relu), block-diagonal
    wfs, tfs = zip(*[layer(p["wf"], p["sf"], p["tf"]) for p in branches])
    stacked.append((block_diag(wfs), jnp.concatenate(tfs, axis=0)))

    # final 1x1 convs, widened to the stacked width so no slicing of the trunk
    # activations is needed; depth read-out (wd, bd) folded in.
    def widened_final(wc, tc, slot):
        wide = jnp.zeros((wc.shape[0], 3 * ch), jnp.float32)
        wide = wide.at[:, slot * ch:(slot + 1) * ch].set(wc)
        return wide, tc

    wc_uv, tc_uv = layer(branches[0]["wc"], branches[0]["sc"], branches[0]["tc"])
    wc_at, tc_at = layer(branches[1]["wc"], branches[1]["sc"], branches[1]["tc"])
    wc_d, tc_d = layer(branches[2]["wc"], branches[2]["sc"], branches[2]["tc"])
    wd = params["wd"]                                   # (K, 1)
    wc_dv = wd.T @ wc_d                                 # (1, ch)
    tc_dv = wd.T @ tc_d + params["bd"]                  # (1, 1); bd folded here
    stacked.append(widened_final(wc_uv, tc_uv, 0))
    stacked.append(widened_final(wc_at, tc_at, 1))
    stacked.append(widened_final(wc_dv, tc_dv, 2))

    # pack into two slabs with 8-aligned row offsets (static in-kernel slices)
    cmax = max(w.shape[1] for w, _ in stacked)
    meta, off = [], 0
    for w, _ in stacked:
        meta.append((off, w.shape[0], w.shape[1]))
        off = ((off + w.shape[0] + 7) // 8) * 8
    w_slab = jnp.zeros((off, cmax), jnp.float32)
    b_slab = jnp.zeros((off, 1), jnp.float32)
    for (o, r, c), (w, t) in zip(meta, stacked):
        w_slab = w_slab.at[o:o + r, :c].set(w)
        b_slab = b_slab.at[o:o + r, :].set(t)

    return {
        "num_classes": C,
        "n_res_blocks": mb,
        "layer_meta": tuple(meta),
        "w_slab": w_slab,
        "b_slab": b_slab,
        "xs": params["xs"], "ys": params["ys"],
        "spread": params["spread"], "betas": params["betas"],
    }


# ----------------------------------------------------------------------------
# Pure-JAX reference (mirrors the PyTorch module, eval-mode BN folded)
# ----------------------------------------------------------------------------
def reference_forward(x_nchw, params, scale_factor=2.0):
    B, Cin, H, W = x_nchw.shape
    C, K = params["num_classes"], params["depth_dim"]
    xf = jnp.transpose(x_nchw, (0, 2, 3, 1)).reshape(B * H * W, Cin)

    def branch(h, p):
        for blk in p["blocks"]:
            h1 = jnp.maximum(h @ blk["w1"] * blk["s1"] + blk["t1"], 0.0)
            h = jnp.maximum(h1 @ blk["w2"] * blk["s2"] + blk["t2"] + h, 0.0)
        h = jnp.maximum(h @ p["wf"] * p["sf"] + p["tf"], 0.0)
        return h @ p["wc"] * p["sc"] + p["tc"]

    def to_bcs(f, c):
        return jnp.transpose(f.reshape(B, H, W, c), (0, 3, 1, 2)).reshape(B, c, H * W)

    uv = to_bcs(branch(xf, params["uv"]), C)
    aux = to_bcs(branch(xf, params["attn"]), C)
    d0 = to_bcs(branch(xf, params["depth"]), K)

    spread = params["spread"].reshape(1, C, 1)
    betas = params["betas"].reshape(1, C, 1)
    sm = lambda z: jax.nn.softmax(z * spread, axis=-1)

    hmp = sm(uv)
    x0 = jnp.sum(hmp * params["xs"].reshape(1, 1, -1), axis=-1, keepdims=True)
    y0 = jnp.sum(hmp * params["ys"].reshape(1, 1, -1), axis=-1, keepdims=True)
    attn_map = sm(betas * aux + (1.0 - betas) * uv)
    feat = jnp.einsum("bcs,bks->bck", attn_map, d0)
    d_est = jnp.einsum("bck,ko->bco", feat, params["wd"]) + params["bd"][0, 0]
    return jnp.concatenate([x0 * scale_factor, y0 * scale_factor, d_est], axis=-1)


# ----------------------------------------------------------------------------
if __name__ == "__main__":
    key = jax.random.PRNGKey(0)
    B, input_dim, H, W = 2, 32, 8, 8          # num_feats=16, ch=32
    num_classes, depth_dim = 8, 16
    num_blocks, attention_num_blocks = 1, 2   # unequal depths exercise padding

    key, kx, kp = jax.random.split(key, 3)
    x = jax.random.normal(kx, (B, input_dim, H, W), jnp.float32)
    params = init_params(kp, input_dim=input_dim, depth_dim=depth_dim,
                         num_classes=num_classes, num_blocks=num_blocks,
                         attention_num_blocks=attention_num_blocks, H=H, W=W)
    fused = fuse_params(params)   # one-time prep: BN fold + branch stacking

    uvd = estimation_head_forward(x, fused, scale_factor=2.0)
    uvd = jax.block_until_ready(uvd)
    assert uvd.shape == (B, num_classes, 3)

    ref = reference_forward(x, params, scale_factor=2.0)
    err = float(jnp.max(jnp.abs(uvd - ref)))
    if not jnp.allclose(uvd, ref, rtol=1e-2, atol=1e-2):
        raise SystemExit(f"mismatch vs reference, max abs err = {err}")
    print("KERNEL_OK")
</pallas_src>

<mosaic_0001>
module attributes {stable_mosaic.version = 11 : i64} {
  func.func @_fused_head_kernel(%arg0: i32, %arg1: memref<32x128xf32, #tpu.memory_space<vmem>>, %arg2: memref<1x128xf32, #tpu.memory_space<vmem>>, %arg3: memref<1x128xf32, #tpu.memory_space<vmem>>, %arg4: memref<8x1xf32, #tpu.memory_space<vmem>>, %arg5: memref<8x1xf32, #tpu.memory_space<vmem>>, %arg6: memref<408x96xf32, #tpu.memory_space<vmem>>, %arg7: memref<408x1xf32, #tpu.memory_space<vmem>>, %arg8: memref<2x8x3xf32, #tpu.memory_space<vmem>>) attributes {dimension_semantics = [#tpu.dimension_semantics<parallel>], iteration_bounds = array<i64: 1>, scalar_prefetch = 0 : i64, scratch_operands = 0 : i64, tpu.core_type = #tpu.core_type<tc>, window_params = [{transform_indices = @transform_0, window_bounds = array<i64: 32, 128>}, {pipeline_mode = #tpu.pipeline_mode<synchronous>, transform_indices = @transform_1, window_bounds = array<i64: 1, 128>}, {pipeline_mode = #tpu.pipeline_mode<synchronous>, transform_indices = @transform_2, window_bounds = array<i64: 1, 128>}, {pipeline_mode = #tpu.pipeline_mode<synchronous>, transform_indices = @transform_3, window_bounds = array<i64: 8, 1>}, {pipeline_mode = #tpu.pipeline_mode<synchronous>, transform_indices = @transform_4, window_bounds = array<i64: 8, 1>}, {pipeline_mode = #tpu.pipeline_mode<synchronous>, transform_indices = @transform_5, window_bounds = array<i64: 408, 96>}, {pipeline_mode = #tpu.pipeline_mode<synchronous>, transform_indices = @transform_6, window_bounds = array<i64: 408, 1>}, {transform_indices = @transform_7, window_bounds = array<i64: 2, 8, 3>}]} {
    %c0 = arith.constant 0 : index
    %c0_0 = arith.constant 0 : index
    %0 = vector.load %arg1[%c0, %c0_0] : memref<32x128xf32, #tpu.memory_space<vmem>>, vector<32x128xf32>
    %c0_1 = arith.constant 0 : index
    %c0_2 = arith.constant 0 : index
    %1 = vector.load %arg6[%c0_1, %c0_2] : memref<408x96xf32, #tpu.memory_space<vmem>>, vector<48x32xf32>
    %c0_3 = arith.constant 0 : index
    %c0_4 = arith.constant 0 : index
    %2 = vector.load %arg7[%c0_3, %c0_4] : memref<408x1xf32, #tpu.memory_space<vmem>>, vector<48x1xf32>
    %cst = arith.constant dense<0.000000e+00> : vector<48x128xf32>
    %3 = tpu.matmul %1, %0, %cst {dimension_numbers = #tpu.dot_dimension_numbers<[1], [0], [0], [1], [0, 0, 1, 1], [], []>} : vector<48x32xf32>, vector<32x128xf32>, vector<48x128xf32> -> vector<48x128xf32>
    %4 = vector.broadcast %2 : vector<48x1xf32> to vector<48x128xf32>
    %5 = arith.addf %3, %4 : vector<48x128xf32>
    %cst_5 = arith.constant 0.000000e+00 : f32
    %6 = vector.broadcast %cst_5 : f32 to vector<48x128xf32>
    %7 = arith.maximumf %5, %6 : vector<48x128xf32>
    %8 = tpu.concatenate %0, %0, %0 in 0 : vector<32x128xf32>, vector<32x128xf32>, vector<32x128xf32> -> vector<96x128xf32>
    %c48 = arith.constant 48 : index
    %c0_6 = arith.constant 0 : index
    %9 = vector.load %arg6[%c48, %c0_6] : memref<408x96xf32, #tpu.memory_space<vmem>>, vector<96x48xf32>
    %c48_7 = arith.constant 48 : index
    %c0_8 = arith.constant 0 : index
    %10 = vector.load %arg7[%c48_7, %c0_8] : memref<408x1xf32, #tpu.memory_space<vmem>>, vector<96x1xf32>
    %cst_9 = arith.constant dense<0.000000e+00> : vector<96x128xf32>
    %11 = tpu.matmul %9, %7, %cst_9 {dimension_numbers = #tpu.dot_dimension_numbers<[1], [0], [0], [1], [0, 0, 1, 1], [], []>} : vector<96x48xf32>, vector<48x128xf32>, vector<96x128xf32> -> vector<96x128xf32>
    %12 = vector.broadcast %10 : vector<96x1xf32> to vector<96x128xf32>
    %13 = arith.addf %11, %12 : vector<96x128xf32>
    %14 = arith.addf %13, %8 : vector<96x128xf32>
    %cst_10 = arith.constant 0.000000e+00 : f32
    %15 = vector.broadcast %cst_10 : f32 to vector<96x128xf32>
    %16 = arith.maximumf %14, %15 : vector<96x128xf32>
    %c144 = arith.constant 144 : index
    %c0_11 = arith.constant 0 : index
    %17 = vector.load %arg6[%c144, %c0_11] : memref<408x96xf32, #tpu.memory_space<vmem>>, vector<48x96xf32>
    %c144_12 = arith.constant 144 : index
    %c0_13 = arith.constant 0 : index
    %18 = vector.load %arg7[%c144_12, %c0_13] : memref<408x1xf32, #tpu.memory_space<vmem>>, vector<48x1xf32>
    %cst_14 = arith.constant dense<0.000000e+00> : vector<48x128xf32>
    %19 = tpu.matmul %17, %16, %cst_14 {dimension_numbers = #tpu.dot_dimension_numbers<[1], [0], [0], [1], [0, 0, 1, 1], [], []>} : vector<48x96xf32>, vector<96x128xf32>, vector<48x128xf32> -> vector<48x128xf32>
    %20 = vector.broadcast %18 : vector<48x1xf32> to vector<48x128xf32>
    %21 = arith.addf %19, %20 : vector<48x128xf32>
    %cst_15 = arith.constant 0.000000e+00 : f32
    %22 = vector.broadcast %cst_15 : f32 to vector<48x128xf32>
    %23 = arith.maximumf %21, %22 : vector<48x128xf32>
    %c192 = arith.constant 192 : index
    %c0_16 = arith.constant 0 : index
    %24 = vector.load %arg6[%c192, %c0_16] : memref<408x96xf32, #tpu.memory_space<vmem>>, vector<96x48xf32>
    %c192_17 = arith.constant 192 : index
    %c0_18 = arith.constant 0 : index
    %25 = vector.load %arg7[%c192_17, %c0_18] : memref<408x1xf32, #tpu.memory_space<vmem>>, vector<96x1xf32>
    %cst_19 = arith.constant dense<0.000000e+00> : vector<96x128xf32>
    %26 = tpu.matmul %24, %23, %cst_19 {dimension_numbers = #tpu.dot_dimension_numbers<[1], [0], [0], [1], [0, 0, 1, 1], [], []>} : vector<96x48xf32>, vector<48x128xf32>, vector<96x128xf32> -> vector<96x128xf32>
    %27 = vector.broadcast %25 : vector<96x1xf32> to vector<96x128xf32>
    %28 = arith.addf %26, %27 : vector<96x128xf32>
    %29 = arith.addf %28, %16 : vector<96x128xf32>
    %cst_20 = arith.constant 0.000000e+00 : f32
    %30 = vector.broadcast %cst_20 : f32 to vector<96x128xf32>
    %31 = arith.maximumf %29, %30 : vector<96x128xf32>
    %c288 = arith.constant 288 : index
    %c0_21 = arith.constant 0 : index
    %32 = vector.load %arg6[%c288, %c0_21] : memref<408x96xf32, #tpu.memory_space<vmem>>, vector<96x96xf32>
    %c288_22 = arith.constant 288 : index
    %c0_23 = arith.constant 0 : index
    %33 = vector.load %arg7[%c288_22, %c0_23] : memref<408x1xf32, #tpu.memory_space<vmem>>, vector<96x1xf32>
    %cst_24 = arith.constant dense<0.000000e+00> : vector<96x128xf32>
    %34 = tpu.matmul %32, %31, %cst_24 {dimension_numbers = #tpu.dot_dimension_numbers<[1], [0], [0], [1], [0, 0, 1, 1], [], []>} : vector<96x96xf32>, vector<96x128xf32>, vector<96x128xf32> -> vector<96x128xf32>
    %35 = vector.broadcast %33 : vector<96x1xf32> to vector<96x128xf32>
    %36 = arith.addf %34, %35 : vector<96x128xf32>
    %cst_25 = arith.constant 0.000000e+00 : f32
    %37 = vector.broadcast %cst_25 : f32 to vector<96x128xf32>
    %38 = arith.maximumf %36, %37 : vector<96x128xf32>
    %c384 = arith.constant 384 : index
    %c0_26 = arith.constant 0 : index
    %39 = vector.load %arg6[%c384, %c0_26] : memref<408x96xf32, #tpu.memory_space<vmem>>, vector<8x96xf32>
    %c384_27 = arith.constant 384 : index
    %c0_28 = arith.constant 0 : index
    %40 = vector.load %arg7[%c384_27, %c0_28] : memref<408x1xf32, #tpu.memory_space<vmem>>, vector<8x1xf32>
    %cst_29 = arith.constant dense<0.000000e+00> : vector<8x128xf32>
    %41 = tpu.matmul %39, %38, %cst_29 {dimension_numbers = #tpu.dot_dimension_numbers<[1], [0], [0], [1], [0, 0, 1, 1], [], []>} : vector<8x96xf32>, vector<96x128xf32>, vector<8x128xf32> -> vector<8x128xf32>
    %42 = vector.broadcast %40 : vector<8x1xf32> to vector<8x128xf32>
    %43 = arith.addf %41, %42 : vector<8x128xf32>
    %c392 = arith.constant 392 : index
    %c0_30 = arith.constant 0 : index
    %44 = vector.load %arg6[%c392, %c0_30] : memref<408x96xf32, #tpu.memory_space<vmem>>, vector<8x96xf32>
    %c392_31 = arith.constant 392 : index
    %c0_32 = arith.constant 0 : index
    %45 = vector.load %arg7[%c392_31, %c0_32] : memref<408x1xf32, #tpu.memory_space<vmem>>, vector<8x1xf32>
    %cst_33 = arith.constant dense<0.000000e+00> : vector<8x128xf32>
    %46 = tpu.matmul %44, %38, %cst_33 {dimension_numbers = #tpu.dot_dimension_numbers<[1], [0], [0], [1], [0, 0, 1, 1], [], []>} : vector<8x96xf32>, vector<96x128xf32>, vector<8x128xf32> -> vector<8x128xf32>
    %47 = vector.broadcast %45 : vector<8x1xf32> to vector<8x128xf32>
    %48 = arith.addf %46, %47 : vector<8x128xf32>
    %c400 = arith.constant 400 : index
    %c0_34 = arith.constant 0 : index
    %49 = vector.load %arg6[%c400, %c0_34] : memref<408x96xf32, #tpu.memory_space<vmem>>, vector<1x96xf32>
    %c400_35 = arith.constant 400 : index
    %c0_36 = arith.constant 0 : index
    %50 = vector.load %arg7[%c400_35, %c0_36] : memref<408x1xf32, #tpu.memory_space<vmem>>, vector<1x1xf32>
    %cst_37 = arith.constant dense<0.000000e+00> : vector<1x128xf32>
    %51 = tpu.matmul %49, %38, %cst_37 {dimension_numbers = #tpu.dot_dimension_numbers<[1], [0], [0], [1], [0, 0, 1, 1], [], []>} : vector<1x96xf32>, vector<96x128xf32>, vector<1x128xf32> -> vector<1x128xf32>
    %52 = vector.broadcast %50 : vector<1x1xf32> to vector<1x128xf32>
    %53 = arith.addf %51, %52 : vector<1x128xf32>
    %c0_38 = arith.constant 0 : index
    %c0_39 = arith.constant 0 : index
    %54 = vector.load %arg4[%c0_38, %c0_39] : memref<8x1xf32, #tpu.memory_space<vmem>>, vector<8x1xf32>
    %c0_40 = arith.constant 0 : index
    %c0_41 = arith.constant 0 : index
    %55 = vector.load %arg5[%c0_40, %c0_41] : memref<8x1xf32, #tpu.memory_space<vmem>>, vector<8x1xf32>
    %56 = vector.broadcast %54 : vector<8x1xf32> to vector<8x128xf32>
    %57 = arith.mulf %43, %56 : vector<8x128xf32>
    %58 = vector.broadcast %54 : vector<8x1xf32> to vector<8x128xf32>
    %59 = arith.mulf %48, %58 : vector<8x128xf32>
    %60 = arith.subf %59, %57 : vector<8x128xf32>
    %61 = vector.broadcast %55 : vector<8x1xf32> to vector<8x128xf32>
    %62 = arith.mulf %61, %60 : vector<8x128xf32>
    %63 = arith.addf %57, %62 : vector<8x128xf32>
    %c0_42 = arith.constant 0 : index
    %c0_43 = arith.constant 0 : index
    %64 = vector.load %arg2[%c0_42, %c0_43] : memref<1x128xf32, #tpu.memory_space<vmem>>, vector<1x128xf32>
    %c0_44 = arith.constant 0 : index
    %c0_45 = arith.constant 0 : index
    %65 = vector.load %arg3[%c0_44, %c0_45] : memref<1x128xf32, #tpu.memory_space<vmem>>, vector<1x128xf32>
    %66 = tpu.iota {dimensions = array<i32: 1>} : vector<8x128xi32>
    %67 = tpu.iota {dimensions = array<i32: 1>} : vector<8x3xi32>
    %c0_i32 = arith.constant 0 : i32
    %68 = vector.broadcast %c0_i32 : i32 to vector<8x128xi32>
    %69 = arith.cmpi sge, %66, %68 : vector<8x128xi32>
    %c64_i32 = arith.constant 64 : i32
    %70 = vector.broadcast %c64_i32 : i32 to vector<8x128xi32>
    %71 = arith.cmpi slt, %66, %70 : vector<8x128xi32>
    %72 = arith.andi %69, %71 : vector<8x128xi1>
    %cst_46 = arith.constant 0xFF800000 : f32
    %73 = vector.broadcast %cst_46 : f32 to vector<8x128xf32>
    %74 = arith.select %72, %57, %73 : vector<8x128xi1>, vector<8x128xf32>
    %cst_47 = arith.constant dense<0xFF800000> : vector<8xf32>
    %75 = vector.multi_reduction <maximumf>, %74, %cst_47 [1] : vector<8x128xf32> to vector<8xf32>
    %76 = vector.shape_cast %75 : vector<8xf32> to vector<8x1xf32>
    %77 = vector.broadcast %76 : vector<8x1xf32> to vector<8x128xf32>
    %78 = arith.subf %74, %77 : vector<8x128xf32>
    %79 = math.exp %78 : vector<8x128xf32>
    %cst_48 = arith.constant dense<0.000000e+00> : vector<8xf32>
    %80 = vector.multi_reduction <add>, %79, %cst_48 [1] : vector<8x128xf32> to vector<8xf32>
    %81 = vector.shape_cast %80 : vector<8xf32> to vector<8x1xf32>
    %82 = tpu.reciprocal %81 {approx = true} : vector<8x1xf32> -> vector<8x1xf32>
    %83 = vector.broadcast %82 : vector<8x1xf32> to vector<8x128xf32>
    %84 = arith.mulf %79, %83 : vector<8x128xf32>
    %85 = vector.broadcast %64 : vector<1x128xf32> to vector<8x128xf32>
    %86 = arith.mulf %84, %85 : vector<8x128xf32>
    %cst_49 = arith.constant dense<0.000000e+00> : vector<8xf32>
    %87 = vector.multi_reduction <add>, %86, %cst_49 [1] : vector<8x128xf32> to vector<8xf32>
    %88 = vector.shape_cast %87 : vector<8xf32> to vector<8x1xf32>
    %89 = vector.broadcast %65 : vector<1x128xf32> to vector<8x128xf32>
    %90 = arith.mulf %84, %89 : vector<8x128xf32>
    %cst_50 = arith.constant dense<0.000000e+00> : vector<8xf32>
    %91 = vector.multi_reduction <add>, %90, %cst_50 [1] : vector<8x128xf32> to vector<8xf32>
    %92 = vector.shape_cast %91 : vector<8xf32> to vector<8x1xf32>
    %cst_51 = arith.constant 0xFF800000 : f32
    %93 = vector.broadcast %cst_51 : f32 to vector<8x128xf32>
    %94 = arith.select %72, %63, %93 : vector<8x128xi1>, vector<8x128xf32>
    %cst_52 = arith.constant dense<0xFF800000> : vector<8xf32>
    %95 = vector.multi_reduction <maximumf>, %94, %cst_52 [1] : vector<8x128xf32> to vector<8xf32>
    %96 = vector.shape_cast %95 : vector<8xf32> to vector<8x1xf32>
    %97 = vector.broadcast %96 : vector<8x1xf32> to vector<8x128xf32>
    %98 = arith.subf %94, %97 : vector<8x128xf32>
    %99 = math.exp %98 : vector<8x128xf32>
    %cst_53 = arith.constant dense<0.000000e+00> : vector<8xf32>
    %100 = vector.multi_reduction <add>, %99, %cst_53 [1] : vector<8x128xf32> to vector<8xf32>
    %101 = vector.shape_cast %100 : vector<8xf32> to vector<8x1xf32>
    %102 = tpu.reciprocal %101 {approx = true} : vector<8x1xf32> -> vector<8x1xf32>
    %103 = vector.broadcast %102 : vector<8x1xf32> to vector<8x128xf32>
    %104 = arith.mulf %99, %103 : vector<8x128xf32>
    %105 = vector.broadcast %53 : vector<1x128xf32> to vector<8x128xf32>
    %106 = arith.mulf %104, %105 : vector<8x128xf32>
    %cst_54 = arith.constant dense<0.000000e+00> : vector<8xf32>
    %107 = vector.multi_reduction <add>, %106, %cst_54 [1] : vector<8x128xf32> to vector<8xf32>
    %108 = vector.shape_cast %107 : vector<8xf32> to vector<8x1xf32>
    %c0_i32_55 = arith.constant 0 : i32
    %109 = vector.broadcast %c0_i32_55 : i32 to vector<8x3xi32>
    %110 = arith.cmpi eq, %67, %109 : vector<8x3xi32>
    %cst_56 = arith.constant 2.000000e+00 : f32
    %111 = vector.broadcast %cst_56 : f32 to vector<8x1xf32>
    %112 = arith.mulf %88, %111 : vector<8x1xf32>
    %c1_i32 = arith.constant 1 : i32
    %113 = vector.broadcast %c1_i32 : i32 to vector<8x3xi32>
    %114 = arith.cmpi eq, %67, %113 : vector<8x3xi32>
    %cst_57 = arith.constant 2.000000e+00 : f32
    %115 = vector.broadcast %cst_57 : f32 to vector<8x1xf32>
    %116 = arith.mulf %92, %115 : vector<8x1xf32>
    %117 = vector.shape_cast %116 : vector<8x1xf32> to vector<8x1xf32>
    %118 = vector.broadcast %117 : vector<8x1xf32> to vector<8x3xf32>
    %119 = vector.shape_cast %108 : vector<8x1xf32> to vector<8x1xf32>
    %120 = vector.broadcast %119 : vector<8x1xf32> to vector<8x3xf32>
    %121 = arith.select %114, %118, %120 : vector<8x3xi1>, vector<8x3xf32>
    %122 = vector.shape_cast %112 : vector<8x1xf32> to vector<8x1xf32>
    %123 = vector.broadcast %122 : vector<8x1xf32> to vector<8x3xf32>
    %124 = arith.select %110, %123, %121 : vector<8x3xi1>, vector<8x3xf32>
    %c0_58 = arith.constant 0 : index
    %c0_59 = arith.constant 0 : index
    %c0_60 = arith.constant 0 : index
    %125 = vector.load %arg8[%c0_58, %c0_59, %c0_60] : memref<2x8x3xf32, #tpu.memory_space<vmem>>, vector<1x8x3xf32>
    %126 = vector.shape_cast %125 : vector<1x8x3xf32> to vector<8x3xf32>
    %127 = vector.shape_cast %124 : vector<8x3xf32> to vector<1x8x3xf32>
    tpu.vector_store %arg8[%c0_58, %c0_59, %c0_60], %127 {strides = array<i32>} : memref<2x8x3xf32, #tpu.memory_space<vmem>>, vector<1x8x3xf32>,
    %c64_i32_61 = arith.constant 64 : i32
    %128 = vector.broadcast %c64_i32_61 : i32 to vector<8x128xi32>
    %129 = arith.cmpi sge, %66, %128 : vector<8x128xi32>
    %c128_i32 = arith.constant 128 : i32
    %130 = vector.broadcast %c128_i32 : i32 to vector<8x128xi32>
    %131 = arith.cmpi slt, %66, %130 : vector<8x128xi32>
    %132 = arith.andi %129, %131 : vector<8x128xi1>
    %cst_62 = arith.constant 0xFF800000 : f32
    %133 = vector.broadcast %cst_62 : f32 to vector<8x128xf32>
    %134 = arith.select %132, %57, %133 : vector<8x128xi1>, vector<8x128xf32>
    %cst_63 = arith.constant dense<0xFF800000> : vector<8xf32>
    %135 = vector.multi_reduction <maximumf>, %134, %cst_63 [1] : vector<8x128xf32> to vector<8xf32>
    %136 = vector.shape_cast %135 : vector<8xf32> to vector<8x1xf32>
    %137 = vector.broadcast %136 : vector<8x1xf32> to vector<8x128xf32>
    %138 = arith.subf %134, %137 : vector<8x128xf32>
    %139 = math.exp %138 : vector<8x128xf32>
    %cst_64 = arith.constant dense<0.000000e+00> : vector<8xf32>
    %140 = vector.multi_reduction <add>, %139, %cst_64 [1] : vector<8x128xf32> to vector<8xf32>
    %141 = vector.shape_cast %140 : vector<8xf32> to vector<8x1xf32>
    %142 = tpu.reciprocal %141 {approx = true} : vector<8x1xf32> -> vector<8x1xf32>
    %143 = vector.broadcast %142 : vector<8x1xf32> to vector<8x128xf32>
    %144 = arith.mulf %139, %143 : vector<8x128xf32>
    %145 = vector.broadcast %64 : vector<1x128xf32> to vector<8x128xf32>
    %146 = arith.mulf %144, %145 : vector<8x128xf32>
    %cst_65 = arith.constant dense<0.000000e+00> : vector<8xf32>
    %147 = vector.multi_reduction <add>, %146, %cst_65 [1] : vector<8x128xf32> to vector<8xf32>
    %148 = vector.shape_cast %147 : vector<8xf32> to vector<8x1xf32>
    %149 = vector.broadcast %65 : vector<1x128xf32> to vector<8x128xf32>
    %150 = arith.mulf %144, %149 : vector<8x128xf32>
    %cst_66 = arith.constant dense<0.000000e+00> : vector<8xf32>
    %151 = vector.multi_reduction <add>, %150, %cst_66 [1] : vector<8x128xf32> to vector<8xf32>
    %152 = vector.shape_cast %151 : vector<8xf32> to vector<8x1xf32>
    %cst_67 = arith.constant 0xFF800000 : f32
    %153 = vector.broadcast %cst_67 : f32 to vector<8x128xf32>
    %154 = arith.select %132, %63, %153 : vector<8x128xi1>, vector<8x128xf32>
    %cst_68 = arith.constant dense<0xFF800000> : vector<8xf32>
    %155 = vector.multi_reduction <maximumf>, %154, %cst_68 [1] : vector<8x128xf32> to vector<8xf32>
    %156 = vector.shape_cast %155 : vector<8xf32> to vector<8x1xf32>
    %157 = vector.broadcast %156 : vector<8x1xf32> to vector<8x128xf32>
    %158 = arith.subf %154, %157 : vector<8x128xf32>
    %159 = math.exp %158 : vector<8x128xf32>
    %cst_69 = arith.constant dense<0.000000e+00> : vector<8xf32>
    %160 = vector.multi_reduction <add>, %159, %cst_69 [1] : vector<8x128xf32> to vector<8xf32>
    %161 = vector.shape_cast %160 : vector<8xf32> to vector<8x1xf32>
    %162 = tpu.reciprocal %161 {approx = true} : vector<8x1xf32> -> vector<8x1xf32>
    %163 = vector.broadcast %162 : vector<8x1xf32> to vector<8x128xf32>
    %164 = arith.mulf %159, %163 : vector<8x128xf32>
    %165 = vector.broadcast %53 : vector<1x128xf32> to vector<8x128xf32>
    %166 = arith.mulf %164, %165 : vector<8x128xf32>
    %cst_70 = arith.constant dense<0.000000e+00> : vector<8xf32>
    %167 = vector.multi_reduction <add>, %166, %cst_70 [1] : vector<8x128xf32> to vector<8xf32>
    %168 = vector.shape_cast %167 : vector<8xf32> to vector<8x1xf32>
    %c0_i32_71 = arith.constant 0 : i32
    %169 = vector.broadcast %c0_i32_71 : i32 to vector<8x3xi32>
    %170 = arith.cmpi eq, %67, %169 : vector<8x3xi32>
    %cst_72 = arith.constant 2.000000e+00 : f32
    %171 = vector.broadcast %cst_72 : f32 to vector<8x1xf32>
    %172 = arith.mulf %148, %171 : vector<8x1xf32>
    %c1_i32_73 = arith.constant 1 : i32
    %173 = vector.broadcast %c1_i32_73 : i32 to vector<8x3xi32>
    %174 = arith.cmpi eq, %67, %173 : vector<8x3xi32>
    %cst_74 = arith.constant 2.000000e+00 : f32
    %175 = vector.broadcast %cst_74 : f32 to vector<8x1xf32>
    %176 = arith.mulf %152, %175 : vector<8x1xf32>
    %177 = vector.shape_cast %176 : vector<8x1xf32> to vector<8x1xf32>
    %178 = vector.broadcast %177 : vector<8x1xf32> to vector<8x3xf32>
    %179 = vector.shape_cast %168 : vector<8x1xf32> to vector<8x1xf32>
    %180 = vector.broadcast %179 : vector<8x1xf32> to vector<8x3xf32>
    %181 = arith.select %174, %178, %180 : vector<8x3xi1>, vector<8x3xf32>
    %182 = vector.shape_cast %172 : vector<8x1xf32> to vector<8x1xf32>
    %183 = vector.broadcast %182 : vector<8x1xf32> to vector<8x3xf32>
    %184 = arith.select %170, %183, %181 : vector<8x3xi1>, vector<8x3xf32>
    %c1 = arith.constant 1 : index
    %c0_75 = arith.constant 0 : index
    %c0_76 = arith.constant 0 : index
    %185 = vector.load %arg8[%c1, %c0_75, %c0_76] : memref<2x8x3xf32, #tpu.memory_space<vmem>>, vector<1x8x3xf32>
    %186 = vector.shape_cast %185 : vector<1x8x3xf32> to vector<8x3xf32>
    %187 = vector.shape_cast %184 : vector<8x3xf32> to vector<1x8x3xf32>
    tpu.vector_store %arg8[%c1, %c0_75, %c0_76], %187 {strides = array<i32>} : memref<2x8x3xf32, #tpu.memory_space<vmem>>, vector<1x8x3xf32>,
    return
  }
  func.func @transform_0(%arg0: i32) -> (i32, i32) {
    %c0_i32 = arith.constant 0 : i32
    %c0_i32_0 = arith.constant 0 : i32
    return %c0_i32, %arg0 : i32, i32
  }
  func.func @transform_1(%arg0: i32) -> (i32, i32) {
    %c0_i32 = arith.constant 0 : i32
    %c0_i32_0 = arith.constant 0 : i32
    %c0_i32_1 = arith.constant 0 : i32
    return %c0_i32, %c0_i32_0 : i32, i32
  }
  func.func @transform_2(%arg0: i32) -> (i32, i32) {
    %c0_i32 = arith.constant 0 : i32
    %c0_i32_0 = arith.constant 0 : i32
    %c0_i32_1 = arith.constant 0 : i32
    return %c0_i32, %c0_i32_0 : i32, i32
  }
  func.func @transform_3(%arg0: i32) -> (i32, i32) {
    %c0_i32 = arith.constant 0 : i32
    %c0_i32_0 = arith.constant 0 : i32
    %c0_i32_1 = arith.constant 0 : i32
    return %c0_i32, %c0_i32_0 : i32, i32
  }
  func.func @transform_4(%arg0: i32) -> (i32, i32) {
    %c0_i32 = arith.constant 0 : i32
    %c0_i32_0 = arith.constant 0 : i32
    %c0_i32_1 = arith.constant 0 : i32
    return %c0_i32, %c0_i32_0 : i32, i32
  }
  func.func @transform_5(%arg0: i32) -> (i32, i32) {
    %c0_i32 = arith.constant 0 : i32
    %c0_i32_0 = arith.constant 0 : i32
    %c0_i32_1 = arith.constant 0 : i32
    return %c0_i32, %c0_i32_0 : i32, i32
  }
  func.func @transform_6(%arg0: i32) -> (i32, i32) {
    %c0_i32 = arith.constant 0 : i32
    %c0_i32_0 = arith.constant 0 : i32
    %c0_i32_1 = arith.constant 0 : i32
    return %c0_i32, %c0_i32_0 : i32, i32
  }
  func.func @transform_7(%arg0: i32) -> (i32, i32, i32) {
    %c0_i32 = arith.constant 0 : i32
    %c0_i32_0 = arith.constant 0 : i32
    %c0_i32_1 = arith.constant 0 : i32
    return %arg0, %c0_i32, %c0_i32_0 : i32, i32, i32
  }
}

</mosaic_0001>

<bundles_post_ra>
// kernel: tpu_custom_call.1
= control target key start
LH: loop header
LB: loop body
LE: loop exit
PB: predicated region body
PF: predicated region fallthrough
CT: control target
= control target key end

     0   :  { %v1104_v0 = vmov 0   ;;  %vm72_vm0 = vcmask 261120   ;;  %vm216_vm1 = vcmask 392192   ;;  %vm372_vm2 = vcmask 785408   ;;  %s1658_s6 = inlined_call_operand.vmem [shape: f32[408,1], index: 6, kind: input, shape index: {}]   ;;  %s1659_s0 = inlined_call_operand.vmem [shape: f32[32,128], index: 0, kind: input, shape index: {}]   ;;  %s1660_s5 = inlined_call_operand.vmem [shape: f32[408,96], index: 5, kind: input, shape index: {}]   ;;  %s1661_s3 = inlined_call_operand.vmem [shape: f32[8,1], index: 3, kind: input, shape index: {}]   ;;  %s1662_s4 = inlined_call_operand.vmem [shape: f32[8,1], index: 4, kind: input, shape index: {}]   ;;  %s1663_s2 = inlined_call_operand.vmem [shape: f32[1,128], index: 2, kind: input, shape index: {}]   ;;  %s1664_s1 = inlined_call_operand.vmem [shape: f32[1,128], index: 1, kind: input, shape index: {}]   ;;  %s1665_s7 = inlined_call_operand.vmem [shape: f32[2,8,3], index: 7, kind: output, shape index: {}]  }
   0x1   :  { %1085 = vset.pattern.permute.xlu2 %v1104_v0  ;;  %1084 = vset.pattern.permute.xlu1 %v1104_v0  ;;  %v41_v1 = vld [vmem:[%s1658_s6 + $0x28] sm:$0xff]  ;;  %v39_v2 = vld [vmem:[%s1658_s6 + $0x18] sm:$0xff]  ;;  %v1162_v5 = vld [vmem:[%s1659_s0 + $0x10] sm:$0xff]  ;;  %vm970_vm7 = vcmask 23552  }
   0x2   :  { %v37_v3 = vld [vmem:[%s1658_s6 + $0x8] sm:$0xff]  ;;  %1083 = vset.pattern.permute.xlu0 %v1104_v0  ;;  %59 = vperm.xlu1 %1084, %v39_v2   ;;  %v1157_v4 = vld [vmem:[%s1659_s0 + $0x18] sm:$0xff]  ;;  %v1176_v7 = vld [vmem:[%s1659_s0] sm:$0xff] }
   0x3   :  { %69 = vperm.xlu0 %1083, %v41_v1   ;;  %49 = vperm.xlu2 %1085, %v37_v3   ;;  %v1169_v6 = vld [vmem:[%s1659_s0 + $0x8] sm:$0xff]  ;;  %v38_v8 = vld [vmem:[%s1658_s6 + $0x10] sm:$0xff]  ;;  %v33_v9 = vld [vmem:[%s1660_s5 + $0x18] sm:$0xff] }
   0x4   :  { %1066 = vmatpush.msra.mxu2 %v1157_v4  ;;  %103 = vmatpush.msra.mxu0 %v1157_v4  ;;  %v40_v10 = vld [vmem:[%s1658_s6 + $0x20] sm:$0xff]  ;;  %v155_v15 = vld [vmem:[%s1658_s6 + $0x88] sm:$0xff]  ;;  %v153_v16 = vld [vmem:[%s1658_s6 + $0x78] sm:$0xff] }
   0x5   :  { %v36_v11 = vld [vmem:[%s1658_s6] sm:$0xff]  ;;  %v31_v17 = vld [vmem:[%s1660_s5 + $0x8] sm:$0xff]  ;;  %v152_v20 = vld [vmem:[%s1658_s6 + $0x70] sm:$0xff] }
   0x6   :  { %1067 = vmatpush.msra.mxu2 %v1162_v5  ;;  %104 = vmatpush.msra.mxu0 %v1162_v5  ;;  %v30_v12 = vld [vmem:[%s1660_s5] sm:$0xff]  ;;  %v151_v18 = vld [vmem:[%s1658_s6 + $0x68] sm:$0xff]  ;;  %v32_v22 = vld [vmem:[%s1660_s5 + $0x10] sm:$0xff] }
   0x7   :  { %v154_v13 = vld [vmem:[%s1658_s6 + $0x80] sm:$0xff]  ;;  %v35_v19 = vld [vmem:[%s1660_s5 + $0x28] sm:$0xff]  ;;  %v148_v23 = vld [vmem:[%s1658_s6 + $0x50] sm:$0xff] }
   0x8   :  { %1068 = vmatpush.msra.mxu2 %v1169_v6  ;;  %105 = vmatpush.msra.mxu0 %v1169_v6  ;;  %v34_v14 = vld [vmem:[%s1660_s5 + $0x20] sm:$0xff]  ;;  %v149_v24 = vld [vmem:[%s1658_s6 + $0x58] sm:$0xff]  ;;  %v147_v25 = vld [vmem:[%s1658_s6 + $0x48] sm:$0xff] }
   0x9   :  { %v150_v21 = vld [vmem:[%s1658_s6 + $0x60] sm:$0xff]  ;;  %v145_v26 = vld [vmem:[%s1658_s6 + $0x38] sm:$0xff]  ;;  %v144_v28 = vld [vmem:[%s1658_s6 + $0x30] sm:$0xff] }
   0xa   :  { %1069 = vmatpush.msra.mxu2 %v1176_v7  ;;  %54 = vperm.xlu1 %1084, %v38_v8   ;;  %v146_v27 = vld [vmem:[%s1658_s6 + $0x40] sm:$0xff]  ;;  %v340_v29 = vld [vmem:[%s1658_s6 + $0xb0] sm:$0xff]  ;;  %v341_v30 = vld [vmem:[%s1658_s6 + $0xb8] sm:$0xff] }
   0xb   :  { %1017 = vmatmul.msk.f32.vlgmr.msra.gmra.mxu2 %vm72_vm0, %v33_v9  ;;  %64 = vperm.xlu0 %1083, %v40_v10   ;;  %v339_v31 = vld [vmem:[%s1658_s6 + $0xa8] sm:$0xff]  ;;  %v337_v32 = vld [vmem:[%s1658_s6 + $0x98] sm:$0xff]  ;;  %v338_v33 = vld [vmem:[%s1658_s6 + $0xa0] sm:$0xff] }
   0xc   :  { %44 = vperm.xlu2 %1085, %v36_v11   ;;  %106 = vmatpush.msra.mxu0 %v1176_v7  ;;  %v336_v34 = vld [vmem:[%s1658_s6 + $0x90] sm:$0xff]  ;;  %v455_v36 = vld [vmem:[%s1658_s6 + $0x118] sm:$0xff]  ;;  %v453_v37 = vld [vmem:[%s1658_s6 + $0x108] sm:$0xff] }
   0xd   :  { %1014 = vmatmul.msk.f32.vlgmr.msra.gmra.mxu0 %vm72_vm0, %v30_v12  ;;  %v454_v35 = vld [vmem:[%s1658_s6 + $0x110] sm:$0xff]  ;;  %v451_v38 = vld [vmem:[%s1658_s6 + $0xf8] sm:$0xff]  ;;  %v452_v39 = vld [vmem:[%s1658_s6 + $0x100] sm:$0xff] }
   0xe   :  { %v450_v40 = vld [vmem:[%s1658_s6 + $0xf0] sm:$0xff]  ;;  %v448_v41 = vld [vmem:[%s1658_s6 + $0xe0] sm:$0xff]  ;;  %v449_v42 = vld [vmem:[%s1658_s6 + $0xe8] sm:$0xff] }
   0xf   :  { %v447_v43 = vld [vmem:[%s1658_s6 + $0xd8] sm:$0xff]  ;;  %v445_v44 = vld [vmem:[%s1658_s6 + $0xc8] sm:$0xff]  ;;  %v446_v45 = vld [vmem:[%s1658_s6 + $0xd0] sm:$0xff] }
  0x10   :  { %v444_v46 = vld [vmem:[%s1658_s6 + $0xc0] sm:$0xff]  ;;  %v651_v47 = vld [vmem:[%s1658_s6 + $0x170] sm:$0xff]  ;;  %v652_v48 = vld [vmem:[%s1658_s6 + $0x178] sm:$0xff] }
  0x11   :  { %v650_v49 = vld [vmem:[%s1658_s6 + $0x168] sm:$0xff]  ;;  %v648_v50 = vld [vmem:[%s1658_s6 + $0x158] sm:$0xff]  ;;  %v649_v51 = vld [vmem:[%s1658_s6 + $0x160] sm:$0xff] }
  0x12   :  { %208 = vperm.xlu1 %1084, %v154_v13   ;;  %v647_v52 = vld [vmem:[%s1658_s6 + $0x150] sm:$0xff]  ;;  %v645_v53 = vld [vmem:[%s1658_s6 + $0x140] sm:$0xff]  ;;  %v646_v54 = vld [vmem:[%s1658_s6 + $0x148] sm:$0xff] }
  0x13   :  { %1018 = vmatmul.msk.f32.gmra.mxu2 %vm72_vm0, %v34_v14  ;;  %213 = vperm.xlu0 %1083, %v155_v15   ;;  %v644_v55 = vld [vmem:[%s1658_s6 + $0x138] sm:$0xff]  ;;  %v642_v56 = vld [vmem:[%s1658_s6 + $0x128] sm:$0xff]  ;;  %v643_v57 = vld [vmem:[%s1658_s6 + $0x130] sm:$0xff] }
  0x14   :  { %203 = vperm.xlu2 %1085, %v153_v16   ;;  %v641_v58 = vld [vmem:[%s1658_s6 + $0x120] sm:$0xff]  ;;  %v845_v59 = vld [vmem:[%s1658_s6 + $0x188] sm:$0xff] }
  0x15   :  { %1015 = vmatmul.msk.f32.gmra.mxu0 %vm72_vm0, %v31_v17  ;;  %v815_v60 = vld [vmem:[%s1658_s6 + $0x180] sm:$0xff] }
  0x16   :  { %v904_v61 = vld [vmem:[%s1661_s3] sm:$0xff] }
  0x17   :  { %v905_v62 = vld [vmem:[%s1662_s4] sm:$0xff] }
  0x1a   :  { %193 = vperm.xlu1 %1084, %v151_v18  }
  0x1b   :  { %1019 = vmatmul.msk.f32.gmra.mxu2 %vm72_vm0, %v35_v19  ;;  %198 = vperm.xlu0 %1083, %v152_v20  }
  0x1c   :  { %188 = vperm.xlu2 %1085, %v150_v21  }
  0x1d   :  { %1016 = vmatmul.msk.f32.gmra.mxu0 %vm72_vm0, %v32_v22 }
  0x22   :  { %178 = vperm.xlu1 %1084, %v148_v23  }
  0x23   :  { %183 = vperm.xlu0 %1083, %v149_v24  }
  0x24   :  { %173 = vperm.xlu2 %1085, %v147_v25  }
  0x2a   :  { %163 = vperm.xlu1 %1084, %v145_v26  }
  0x2b   :  { %168 = vperm.xlu0 %1083, %v146_v27   ;;  %v132_v27 = vld [vmem:[%s1660_s5 + $0x30] sm:$0xff] }
  0x2c   :  { %158 = vperm.xlu2 %1085, %v144_v28   ;;  %v133_v28 = vld [vmem:[%s1660_s5 + $0x38] sm:$0xff] }
  0x32   :  { %364 = vperm.xlu1 %1084, %v340_v29   ;;  %v134_v29 = vld [vmem:[%s1660_s5 + $0x40] sm:$0xff] }
  0x33   :  { %369 = vperm.xlu0 %1083, %v341_v30   ;;  %v135_v30 = vld [vmem:[%s1660_s5 + $0x48] sm:$0xff] }
  0x34   :  { %359 = vperm.xlu2 %1085, %v339_v31   ;;  %v136_v31 = vld [vmem:[%s1660_s5 + $0x50] sm:$0xff] }
  0x3a   :  { %349 = vperm.xlu1 %1084, %v337_v32   ;;  %v137_v32 = vld [vmem:[%s1660_s5 + $0x58] sm:$0xff] }
  0x3b   :  { %354 = vperm.xlu0 %1083, %v338_v33   ;;  %v138_v33 = vld [vmem:[%s1660_s5 + $0x60] sm:$0xff] }
  0x3c   :  { %344 = vperm.xlu2 %1085, %v336_v34   ;;  %v139_v34 = vld [vmem:[%s1660_s5 + $0x68] sm:$0xff] }
  0x42   :  { %508 = vperm.xlu1 %1084, %v454_v35   ;;  %v140_v35 = vld [vmem:[%s1660_s5 + $0x70] sm:$0xff] }
  0x43   :  { %513 = vperm.xlu0 %1083, %v455_v36   ;;  %v141_v36 = vld [vmem:[%s1660_s5 + $0x78] sm:$0xff] }
  0x44   :  { %503 = vperm.xlu2 %1085, %v453_v37   ;;  %v142_v37 = vld [vmem:[%s1660_s5 + $0x80] sm:$0xff] }
  0x4a   :  { %493 = vperm.xlu1 %1084, %v451_v38   ;;  %v143_v38 = vld [vmem:[%s1660_s5 + $0x88] sm:$0xff] }
  0x4b   :  { %498 = vperm.xlu0 %1083, %v452_v39  }
  0x4c   :  { %488 = vperm.xlu2 %1085, %v450_v40  }
  0x52   :  { %478 = vperm.xlu1 %1084, %v448_v41  }
  0x53   :  { %483 = vperm.xlu0 %1083, %v449_v42  }
  0x54   :  { %473 = vperm.xlu2 %1085, %v447_v43  }
  0x5a   :  { %463 = vperm.xlu1 %1084, %v445_v44  }
  0x5b   :  { %468 = vperm.xlu0 %1083, %v446_v45  }
  0x5c   :  { %458 = vperm.xlu2 %1085, %v444_v46  }
  0x5d   :  { %v50_v9 = vpop.permute.xlu2 %49 }
  0x62   :  { %705 = vperm.xlu1 %1084, %v651_v47  }
  0x63   :  { %710 = vperm.xlu0 %1083, %v652_v48  }
  0x64   :  { %700 = vperm.xlu2 %1085, %v650_v49  }
  0x66   :  { %v45_v22 = vpop.permute.xlu2 %44 }
  0x6a   :  { %690 = vperm.xlu1 %1084, %v648_v50  }
  0x6b   :  { %695 = vperm.xlu0 %1083, %v649_v51  }
  0x6c   :  { %685 = vperm.xlu2 %1085, %v647_v52  }
  0x6e   :  { %v204_v51 = vpop.permute.xlu2 %203 }
  0x72   :  { %675 = vperm.xlu1 %1084, %v645_v53  }
  0x73   :  { %680 = vperm.xlu0 %1083, %v646_v54  }
  0x74   :  { %670 = vperm.xlu2 %1085, %v644_v55   ;;  %v60_v8 = vpop.permute.xlu1 %59 }
  0x75   :  { %v70_v1 = vpop.permute.xlu0 %69 }
  0x76   :  { %v189_v55 = vpop.permute.xlu2 %188 }
  0x7a   :  { %660 = vperm.xlu1 %1084, %v642_v56  }
  0x7b   :  { %665 = vperm.xlu0 %1083, %v643_v57  }
  0x7c   :  { %655 = vperm.xlu2 %1085, %v641_v58   ;;  %v55_v17 = vpop.permute.xlu1 %54 }
  0x7d   :  { %v65_v10 = vpop.permute.xlu0 %64 }
  0x82   :  { %848 = vperm.xlu1 %1084, %v845_v59  }
  0x83   :  { %818 = vperm.xlu0 %1083, %v815_v60  }
  0x84   :  { %908 = vperm.xlu2 %1085, %v904_v61   ;;  %v209_v50 = vpop.permute.xlu1 %208 }
  0x85   :  { %v214_v48 = vpop.permute.xlu0 %213 }
  0x8a   :  { %v108_v63 = vpop.f32.mrf.mxu0 }
  0x8b   :  { %916 = vperm.xlu0 %1083, %v905_v62   ;;  %v109_v23 = vadd.f32 %v108_v63, %v45_v22 }
  0x8c   :  { %v194_v54 = vpop.permute.xlu1 %193 }
  0x8d   :  { %v126_v26 = vmax.f32 %v109_v23, 0.0  ;;  %v199_v53 = vpop.permute.xlu0 %198 }
  0x8e   :  { %v117_v0 = vpop.f32.mrf.mxu2 }
  0x8f   :  { %v118_v15 = vadd.f32 %v117_v0, %v60_v8 }
  0x91   :  { %v129_v20 = vmax.f32 %v118_v15, 0.0 }
  0x92   :  { %v111_v2 = vpop.f32.mrf.mxu0 }
  0x93   :  { %v112_v21 = vadd.f32 %v111_v2, %v50_v9 }
  0x95   :  { %v127_v25 = vmax.f32 %v112_v21, 0.0  ;;  %v184_v63 = vpop.permute.xlu0 %183 }
  0x96   :  { %v120_v3 = vpop.f32.mrf.mxu2 }
  0x97   :  { %v121_v12 = vadd.f32 %v120_v3, %v65_v10  ;;  %v179_v3 = vpop.permute.xlu1 %178 }
  0x99   :  { %v130_v18 = vmax.f32 %v121_v12, 0.0 }
  0x9a   :  { %v114_v14 = vpop.f32.mrf.mxu0 }
  0x9b   :  { %v115_v19 = vadd.f32 %v114_v14, %v55_v17 }
  0x9d   :  { %v128_v24 = vmax.f32 %v115_v19, 0.0  ;;  %v169_v21 = vpop.permute.xlu0 %168 }
  0x9e   :  { %v123_v11 = vpop.f32.mrf.mxu2 }
  0x9f   :  { %v124_v13 = vadd.f32 %v123_v11, %v70_v1  ;;  %v174_v11 = vpop.permute.xlu2 %173 }
  0xa1   :  { %v131_v16 = vmax.f32 %v124_v13, 0.0 }
  0xa3   :  { %263 = vmatpush.msra.mxu1 %v131_v16 }
  0xa5   :  { %264 = vmatpush.msra.mxu1 %v130_v18 }
  0xa7   :  { %265 = vmatpush.msra.mxu1 %v129_v20 }
  0xa9   :  { %266 = vmatpush.msra.mxu1 %v128_v24 }
  0xab   :  { %267 = vmatpush.msra.mxu1 %v127_v25  ;;  %v164_v25 = vpop.permute.xlu1 %163 }
  0xad   :  { %268 = vmatpush.msra.mxu1 %v126_v26 }
  0xae   :  { %1020 = vmatmul.msk.f32.vlgmr.msra.gmra.mxu1 %vm216_vm1, %v132_v27 }
  0xb6   :  { %1021 = vmatmul.msk.f32.gmra.mxu1 %vm216_vm1, %v133_v28 }
  0xbe   :  { %1022 = vmatmul.msk.f32.gmra.mxu1 %vm216_vm1, %v134_v29  ;;  %v159_v29 = vpop.permute.xlu2 %158 }
  0xc6   :  { %1023 = vmatmul.msk.f32.gmra.mxu1 %vm216_vm1, %v135_v30 }
  0xce   :  { %1024 = vmatmul.msk.f32.gmra.mxu1 %vm216_vm1, %v136_v31 }
  0xd6   :  { %1025 = vmatmul.msk.f32.gmra.mxu1 %vm216_vm1, %v137_v32 }
  0xde   :  { %1026 = vmatmul.msk.f32.gmra.mxu1 %vm216_vm1, %v138_v33 }
  0xe6   :  { %1027 = vmatmul.msk.f32.gmra.mxu1 %vm216_vm1, %v139_v34 }
  0xee   :  { %1028 = vmatmul.msk.f32.gmra.mxu1 %vm216_vm1, %v140_v35 }
  0xf6   :  { %1029 = vmatmul.msk.f32.gmra.mxu1 %vm216_vm1, %v141_v36 }
  0xfe   :  { %1030 = vmatmul.msk.f32.gmra.mxu1 %vm216_vm1, %v142_v37  ;;  %v332_v37 = vld [vmem:[%s1660_s5 + $0xa0] sm:$0xff] }
 0x106   :  { %1031 = vmatmul.msk.f32.gmra.mxu1 %vm216_vm1, %v143_v38  ;;  %v333_v38 = vld [vmem:[%s1660_s5 + $0xa8] sm:$0xff] }
 0x12b   :  { %v270_v39 = vpop.f32.mrf.mxu1 }
 0x12c   :  { %v271_v30 = vadd.f32 %v270_v39, %v159_v29  ;;  %v334_v39 = vld [vmem:[%s1660_s5 + $0xb0] sm:$0xff]  ;;  %v440_v29 = vld [vmem:[%s1660_s5 + $0x100] sm:$0xff] }
 0x12e   :  { %v1463_v35 = vadd.f32 %v271_v30, %v1176_v7  ;;  %v441_v30 = vld [vmem:[%s1660_s5 + $0x108] sm:$0xff] }
 0x130   :  { %v318_v36 = vmax.f32 %v1463_v35, 0.0  ;;  %v631_v35 = vld [vmem:[%s1660_s5 + $0x130] sm:$0xff] }
 0x133   :  { %v273_v40 = vpop.f32.mrf.mxu1 }
 0x134   :  { %v274_v26 = vadd.f32 %v273_v40, %v164_v25  ;;  %v335_v40 = vld [vmem:[%s1660_s5 + $0xb8] sm:$0xff]  ;;  %v438_v25 = vld [vmem:[%s1660_s5 + $0xf0] sm:$0xff] }
 0x136   :  { %v1457_v34 = vadd.f32 %v274_v26, %v1169_v6  ;;  %v439_v26 = vld [vmem:[%s1660_s5 + $0xf8] sm:$0xff] }
 0x13b   :  { %v276_v41 = vpop.f32.mrf.mxu1 }
 0x13c   :  { %v277_v22 = vadd.f32 %v276_v41, %v169_v21  ;;  %v436_v21 = vld [vmem:[%s1660_s5 + $0xe0] sm:$0xff] }
 0x13e   :  { %v1451_v32 = vadd.f32 %v277_v22, %v1162_v5  ;;  %v437_v22 = vld [vmem:[%s1660_s5 + $0xe8] sm:$0xff] }
 0x143   :  { %v279_v42 = vpop.f32.mrf.mxu1 }
 0x144   :  { %v280_v18 = vadd.f32 %v279_v42, %v174_v11  ;;  %v432_v11 = vld [vmem:[%s1660_s5 + $0xc0] sm:$0xff] }
 0x146   :  { %v1445_v28 = vadd.f32 %v280_v18, %v1157_v4  ;;  %v435_v18 = vld [vmem:[%s1660_s5 + $0xd8] sm:$0xff] }
 0x148   :  { %v321_v33 = vmax.f32 %v1445_v28, 0.0 }
 0x14b   :  { %v282_v43 = vpop.f32.mrf.mxu1 }
 0x14c   :  { %v283_v15 = vadd.f32 %v282_v43, %v179_v3 }
 0x14e   :  { %v1439_v24 = vadd.f32 %v283_v15, %v1176_v7  ;;  %v434_v15 = vld [vmem:[%s1660_s5 + $0xd0] sm:$0xff] }
 0x150   :  { %v322_v31 = vmax.f32 %v1439_v24, 0.0 }
 0x153   :  { %v285_v44 = vpop.f32.mrf.mxu1 }
 0x154   :  { %v286_v12 = vadd.f32 %v285_v44, %v184_v63 }
 0x156   :  { %v1433_v20 = vadd.f32 %v286_v12, %v1169_v6  ;;  %v433_v12 = vld [vmem:[%s1660_s5 + $0xc8] sm:$0xff] }
 0x158   :  { %v323_v27 = vmax.f32 %v1433_v20, 0.0 }
 0x15b   :  { %v288_v45 = vpop.f32.mrf.mxu1 }
 0x15c   :  { %v289_v8 = vadd.f32 %v288_v45, %v189_v55 }
 0x15e   :  { %v1427_v17 = vadd.f32 %v289_v8, %v1162_v5 }
 0x160   :  { %v324_v23 = vmax.f32 %v1427_v17, 0.0 }
 0x163   :  { %v291_v46 = vpop.f32.mrf.mxu1 }
 0x164   :  { %v292_v0 = vadd.f32 %v291_v46, %v194_v54  ;;  %v370_v46 = vpop.permute.xlu0 %369 }
 0x166   :  { %v1421_v14 = vadd.f32 %v292_v0, %v1157_v4 }
 0x168   :  { %v325_v19 = vmax.f32 %v1421_v14, 0.0 }
 0x16b   :  { %v294_v47 = vpop.f32.mrf.mxu1 }
 0x16c   :  { %v295_v60 = vadd.f32 %v294_v47, %v199_v53  ;;  %v365_v47 = vpop.permute.xlu1 %364  ;;  %v355_v54 = vpop.permute.xlu0 %354 }
 0x16e   :  { %v1415_v10 = vadd.f32 %v295_v60, %v1176_v7  ;;  %v331_v7 = vld [vmem:[%s1660_s5 + $0x98] sm:$0xff] }
 0x170   :  { %v326_v16 = vmax.f32 %v1415_v10, 0.0 }
 0x173   :  { %v297_v49 = vpop.f32.mrf.mxu1 }
 0x174   :  { %v298_v58 = vadd.f32 %v297_v49, %v204_v51 }
 0x176   :  { %v1409_v2 = vadd.f32 %v298_v58, %v1169_v6  ;;  %v330_v6 = vld [vmem:[%s1660_s5 + $0x90] sm:$0xff] }
 0x178   :  { %v327_v13 = vmax.f32 %v1409_v2, 0.0 }
 0x17b   :  { %v300_v52 = vpop.f32.mrf.mxu1 }
 0x17c   :  { %v301_v56 = vadd.f32 %v300_v52, %v209_v50 }
 0x17e   :  { %v1405_v62 = vadd.f32 %v301_v56, %v1162_v5  ;;  %v319_v5 = vmax.f32 %v1457_v34, 0.0  ;;  %v640_v34 = vld [vmem:[%s1660_s5 + $0x178] sm:$0xff] }
 0x180   :  { %v328_v9 = vmax.f32 %v1405_v62, 0.0 }
 0x183   :  { %v303_v57 = vpop.f32.mrf.mxu1 }
 0x184   :  { %v304_v59 = vadd.f32 %v303_v57, %v214_v48  ;;  %v360_v48 = vpop.permute.xlu2 %359  ;;  %v350_v57 = vpop.permute.xlu1 %349 }
 0x186   :  { %v1402_v61 = vadd.f32 %v304_v59, %v1157_v4  ;;  %v320_v4 = vmax.f32 %v1451_v32, 0.0  ;;  %v629_v32 = vld [vmem:[%s1660_s5 + $0x120] sm:$0xff] }
 0x188   :  { %v329_v1 = vmax.f32 %v1402_v61, 0.0 }
 0x18a   :  { %395 = vmatpush.msrb.mxu2 %v329_v1 }
 0x18c   :  { %396 = vmatpush.msrb.mxu2 %v328_v9  ;;  %v345_v60 = vpop.permute.xlu2 %344 }
 0x18e   :  { %397 = vmatpush.msrb.mxu2 %v327_v13 }
 0x190   :  { %398 = vmatpush.msrb.mxu2 %v326_v16 }
 0x192   :  { %399 = vmatpush.msrb.mxu2 %v325_v19 }
 0x194   :  { %400 = vmatpush.msrb.mxu2 %v324_v23 }
 0x196   :  { %401 = vmatpush.msrb.mxu2 %v323_v27 }
 0x198   :  { %402 = vmatpush.msrb.mxu2 %v322_v31 }
 0x19a   :  { %403 = vmatpush.msrb.mxu2 %v321_v33 }
 0x19c   :  { %404 = vmatpush.msrb.mxu2 %v320_v4 }
 0x19e   :  { %405 = vmatpush.msrb.mxu2 %v319_v5 }
 0x1a0   :  { %406 = vmatpush.msrb.mxu2 %v318_v36 }
 0x1a1   :  { %1032 = vmatmul.msk.f32.vlgmr.msrb.gmra.mxu2 %vm372_vm2, %v330_v6  ;;  %v442_v6 = vld [vmem:[%s1660_s5 + $0x110] sm:$0xff] }
 0x1a9   :  { %1033 = vmatmul.msk.f32.gmra.mxu2 %vm372_vm2, %v331_v7  ;;  %v443_v7 = vld [vmem:[%s1660_s5 + $0x118] sm:$0xff] }
 0x1b1   :  { %1034 = vmatmul.msk.f32.gmra.mxu2 %vm372_vm2, %v332_v37 }
 0x1b9   :  { %1035 = vmatmul.msk.f32.gmra.mxu2 %vm372_vm2, %v333_v38 }
 0x1c1   :  { %1036 = vmatmul.msk.f32.gmra.mxu2 %vm372_vm2, %v334_v39 }
 0x1c9   :  { %1037 = vmatmul.msk.f32.gmra.mxu2 %vm372_vm2, %v335_v40 }
 0x224   :  { %v408_v41 = vpop.f32.mrf.mxu2 }
 0x225   :  { %v409_v63 = vadd.f32 %v408_v41, %v345_v60 }
 0x227   :  { %v426_v8 = vmax.f32 %v409_v63, 0.0 }
 0x22c   :  { %v411_v42 = vpop.f32.mrf.mxu2 }
 0x22d   :  { %v412_v58 = vadd.f32 %v411_v42, %v350_v57 }
 0x22f   :  { %v427_v3 = vmax.f32 %v412_v58, 0.0 }
 0x234   :  { %v414_v43 = vpop.f32.mrf.mxu2 }
 0x235   :  { %v415_v55 = vadd.f32 %v414_v43, %v355_v54 }
 0x237   :  { %v428_v0 = vmax.f32 %v415_v55, 0.0 }
 0x23c   :  { %v417_v44 = vpop.f32.mrf.mxu2 }
 0x23d   :  { %v418_v52 = vadd.f32 %v417_v44, %v360_v48  ;;  %v509_v48 = vpop.permute.xlu1 %508 }
 0x23f   :  { %v429_v59 = vmax.f32 %v418_v52, 0.0 }
 0x244   :  { %v420_v45 = vpop.f32.mrf.mxu2 }
 0x245   :  { %v421_v50 = vadd.f32 %v420_v45, %v365_v47  ;;  %v494_v52 = vpop.permute.xlu1 %493 }
 0x247   :  { %v430_v56 = vmax.f32 %v421_v50, 0.0 }
 0x24c   :  { %v423_v49 = vpop.f32.mrf.mxu2 }
 0x24d   :  { %v424_v51 = vadd.f32 %v423_v49, %v370_v46  ;;  %v514_v46 = vpop.permute.xlu0 %513  ;;  %v504_v49 = vpop.permute.xlu2 %503 }
 0x24f   :  { %v431_v53 = vmax.f32 %v424_v51, 0.0 }
 0x251   :  { %562 = vmatpush.msra.mxu3 %v431_v53 }
 0x253   :  { %563 = vmatpush.msra.mxu3 %v430_v56 }
 0x255   :  { %564 = vmatpush.msra.mxu3 %v429_v59  ;;  %v499_v51 = vpop.permute.xlu0 %498  ;;  %v489_v53 = vpop.permute.xlu2 %488 }
 0x257   :  { %565 = vmatpush.msra.mxu3 %v428_v0 }
 0x259   :  { %566 = vmatpush.msra.mxu3 %v427_v3 }
 0x25b   :  { %567 = vmatpush.msra.mxu3 %v426_v8 }
 0x25c   :  { %1038 = vmatmul.msk.f32.vlgmr.msra.gmra.mxu3 %vm216_vm1, %v432_v11  ;;  %v479_v11 = vpop.permute.xlu1 %478 }
 0x25d   :  { %v484_v63 = vpop.permute.xlu0 %483 }
 0x264   :  { %1039 = vmatmul.msk.f32.gmra.mxu3 %vm216_vm1, %v433_v12 }
 0x26c   :  { %1040 = vmatmul.msk.f32.gmra.mxu3 %vm216_vm1, %v434_v15 }
 0x274   :  { %1041 = vmatmul.msk.f32.gmra.mxu3 %vm216_vm1, %v435_v18 }
 0x27c   :  { %1042 = vmatmul.msk.f32.gmra.mxu3 %vm216_vm1, %v436_v21  ;;  %v474_v21 = vpop.permute.xlu2 %473 }
 0x284   :  { %1043 = vmatmul.msk.f32.gmra.mxu3 %vm216_vm1, %v437_v22 }
 0x28c   :  { %1044 = vmatmul.msk.f32.gmra.mxu3 %vm216_vm1, %v438_v25  ;;  %v469_v25 = vpop.permute.xlu0 %468 }
 0x294   :  { %1045 = vmatmul.msk.f32.gmra.mxu3 %vm216_vm1, %v439_v26 }
 0x29c   :  { %1046 = vmatmul.msk.f32.gmra.mxu3 %vm216_vm1, %v440_v29  ;;  %v464_v29 = vpop.permute.xlu1 %463 }
 0x2a4   :  { %1047 = vmatmul.msk.f32.gmra.mxu3 %vm216_vm1, %v441_v30 }
 0x2ac   :  { %1048 = vmatmul.msk.f32.gmra.mxu3 %vm216_vm1, %v442_v6  ;;  %v459_v6 = vpop.permute.xlu2 %458 }
 0x2b4   :  { %1049 = vmatmul.msk.f32.gmra.mxu3 %vm216_vm1, %v443_v7 }
 0x2df   :  { %v1545_v37 = vpop.f32.mrf.mxu3 }
 0x2e0   :  { %v570_v20 = vadd.f32 %v1545_v37, %v459_v6 }
 0x2e2   :  { %v605_v28 = vadd.f32 %v570_v20, %v318_v36  ;;  %v633_v36 = vld [vmem:[%s1660_s5 + $0x140] sm:$0xff] }
 0x2e4   :  { %v617_v37 = vmax.f32 %v605_v28, 0.0  ;;  %v844_v28 = vld [vmem:[%s1660_s5 + $0x188] sm:$0xff] }
 0x2e7   :  { %v572_v38 = vpop.f32.mrf.mxu3 }
 0x2e8   :  { %v573_v30 = vadd.f32 %v572_v38, %v464_v29 }
 0x2ef   :  { %v575_v39 = vpop.f32.mrf.mxu3 }
 0x2f0   :  { %v576_v26 = vadd.f32 %v575_v39, %v469_v25  ;;  %v634_v39 = vld [vmem:[%s1660_s5 + $0x148] sm:$0xff] }
 0x2f2   :  { %v607_v7 = vadd.f32 %v576_v26, %v320_v4  ;;  %v630_v4 = vld [vmem:[%s1660_s5 + $0x128] sm:$0xff] }
 0x2f4   :  { %v619_v38 = vmax.f32 %v607_v7, 0.0 }
 0x2f7   :  { %v578_v40 = vpop.f32.mrf.mxu3 }
 0x2f8   :  { %v579_v22 = vadd.f32 %v578_v40, %v474_v21  ;;  %v635_v40 = vld [vmem:[%s1660_s5 + $0x150] sm:$0xff] }
 0x2ff   :  { %v581_v41 = vpop.f32.mrf.mxu3 }
 0x307   :  { %v584_v42 = vpop.f32.mrf.mxu3 }
 0x308   :  { %v585_v61 = vadd.f32 %v584_v42, %v484_v63  ;;  %v637_v42 = vld [vmem:[%s1660_s5 + $0x160] sm:$0xff] }
 0x30f   :  { %v587_v43 = vpop.f32.mrf.mxu3 }
 0x310   :  { %v588_v12 = vadd.f32 %v587_v43, %v489_v53  ;;  %v638_v43 = vld [vmem:[%s1660_s5 + $0x168] sm:$0xff] }
 0x317   :  { %v590_v44 = vpop.f32.mrf.mxu3 }
 0x318   :  { %v591_v0 = vadd.f32 %v590_v44, %v494_v52  ;;  %v639_v44 = vld [vmem:[%s1660_s5 + $0x170] sm:$0xff] }
 0x31f   :  { %v593_v45 = vpop.f32.mrf.mxu3 }
 0x320   :  { %v594_v58 = vadd.f32 %v593_v45, %v499_v51 }
 0x322   :  { %v613_v18 = vadd.f32 %v594_v58, %v326_v16  ;;  %v610_v16 = vadd.f32 %v585_v61, %v323_v27  ;;  %v706_v58 = vpop.permute.xlu1 %705 }
 0x324   :  { %v625_v2 = vmax.f32 %v613_v18, 0.0  ;;  %v622_v17 = vmax.f32 %v610_v16, 0.0 }
 0x327   :  { %v596_v47 = vpop.f32.mrf.mxu3 }
 0x328   :  { %v597_v56 = vadd.f32 %v596_v47, %v504_v49 }
 0x32a   :  { %v614_v8 = vadd.f32 %v597_v56, %v327_v13  ;;  %v611_v13 = vadd.f32 %v588_v12, %v324_v23  ;;  %v608_v23 = vadd.f32 %v579_v22, %v321_v33 }
 0x32c   :  { %v626_v62 = vmax.f32 %v614_v8, 0.0  ;;  %v623_v14 = vmax.f32 %v611_v13, 0.0  ;;  %v620_v24 = vmax.f32 %v608_v23, 0.0 }
 0x32f   :  { %v599_v50 = vpop.f32.mrf.mxu3 }
 0x330   :  { %v600_v54 = vadd.f32 %v599_v50, %v509_v48 }
 0x332   :  { %v615_v60 = vadd.f32 %v600_v54, %v328_v9  ;;  %v582_v9 = vadd.f32 %v581_v41, %v479_v11  ;;  %v636_v41 = vld [vmem:[%s1660_s5 + $0x158] sm:$0xff] }
 0x334   :  { %v627_v15 = vmax.f32 %v615_v60, 0.0 }
 0x337   :  { %v602_v55 = vpop.f32.mrf.mxu3 }
 0x338   :  { %v603_v57 = vadd.f32 %v602_v55, %v514_v46  ;;  %v711_v46 = vpop.permute.xlu0 %710 }
 0x33a   :  { %v616_v59 = vadd.f32 %v603_v57, %v329_v1  ;;  %v612_v1 = vadd.f32 %v591_v0, %v325_v19  ;;  %v609_v19 = vadd.f32 %v582_v9, %v322_v31  ;;  %v606_v31 = vadd.f32 %v573_v30, %v319_v5  ;;  %v632_v5 = vld [vmem:[%s1660_s5 + $0x138] sm:$0xff]  ;;  %v691_v0 = vpop.permute.xlu1 %690 }
 0x33c   :  { %v628_v3 = vmax.f32 %v616_v59, 0.0  ;;  %v624_v10 = vmax.f32 %v612_v1, 0.0  ;;  %v621_v27 = vmax.f32 %v609_v19, 0.0  ;;  %v618_v33 = vmax.f32 %v606_v31, 0.0  ;;  %v701_v59 = vpop.permute.xlu2 %700 }
 0x33e   :  { %753 = vmatpush.msrb.mxu0 %v628_v3  ;;  %1070 = vmatpush.msrb.mxu3 %v628_v3 }
 0x340   :  { %754 = vmatpush.msrb.mxu0 %v627_v15  ;;  %1071 = vmatpush.msrb.mxu3 %v627_v15  ;;  %v696_v63 = vpop.permute.xlu0 %695 }
 0x342   :  { %755 = vmatpush.msrb.mxu0 %v626_v62  ;;  %1072 = vmatpush.msrb.mxu3 %v626_v62  ;;  %v676_v1 = vpop.permute.xlu1 %675 }
 0x344   :  { %756 = vmatpush.msrb.mxu0 %v625_v2  ;;  %1073 = vmatpush.msrb.mxu3 %v625_v2  ;;  %v686_v3 = vpop.permute.xlu2 %685 }
 0x346   :  { %757 = vmatpush.msrb.mxu0 %v624_v10  ;;  %1074 = vmatpush.msrb.mxu3 %v624_v10 }
 0x348   :  { %758 = vmatpush.msrb.mxu0 %v623_v14  ;;  %1075 = vmatpush.msrb.mxu3 %v623_v14  ;;  %v681_v21 = vpop.permute.xlu0 %680 }
 0x34a   :  { %759 = vmatpush.msrb.mxu0 %v622_v17  ;;  %1076 = vmatpush.msrb.mxu3 %v622_v17  ;;  %v661_v17 = vpop.permute.xlu1 %660 }
 0x34c   :  { %760 = vmatpush.msrb.mxu0 %v621_v27  ;;  %1077 = vmatpush.msrb.mxu3 %v621_v27  ;;  %v671_v13 = vpop.permute.xlu2 %670 }
 0x34e   :  { %761 = vmatpush.msrb.mxu0 %v620_v24  ;;  %1078 = vmatpush.msrb.mxu3 %v620_v24 }
 0x350   :  { %762 = vmatpush.msrb.mxu0 %v619_v38  ;;  %1079 = vmatpush.msrb.mxu3 %v619_v38  ;;  %v666_v19 = vpop.permute.xlu0 %665  ;;  %v814_v38 = vld [vmem:[%s1660_s5 + $0x180] sm:$0xff] }
 0x352   :  { %763 = vmatpush.msrb.mxu0 %v618_v33  ;;  %1080 = vmatpush.msrb.mxu3 %v618_v33  ;;  %v923_v33 = vlaneseq }
 0x354   :  { %764 = vmatpush.msrb.mxu0 %v617_v37  ;;  %1081 = vmatpush.msrb.mxu3 %v617_v37  ;;  %v656_v20 = vpop.permute.xlu2 %655  ;;  %v1633_v37 = vand.u32 127, %v923_v33 }
 0x355   :  { %1050 = vmatmul.msk.f32.vlgmr.msrb.gmra.mxu0 %vm372_vm2, %v629_v32  ;;  %1061 = vmatmul.msk.f32.vlgmr.msrb.gmra.mxu3 %vm372_vm2, %v640_v34 }
 0x356   :  { %vm972_vm3 = vcmp.ge.s32.totalorder %v1633_v37, 64  ;;  %vm926_vm4 = vcmp.lt.s32.totalorder %v1633_v37, 64  ;;  %vm966_vm5 = vcmp.eq.s32.totalorder %v1633_v37, 1  ;;  %vm964_vm6 = vcmp.eq.s32.totalorder %v1633_v37, 0 }
 0x358   :  { %v819_v32 = vpop.permute.xlu0 %818 }
 0x35d   :  { %1051 = vmatmul.msk.f32.gmra.mxu0 %vm372_vm2, %v630_v4 }
 0x365   :  { %1052 = vmatmul.msk.f32.gmra.mxu0 %vm372_vm2, %v631_v35  ;;  %v909_v35 = vpop.permute.xlu2 %908 }
 0x36d   :  { %1053 = vmatmul.msk.f32.gmra.mxu0 %vm372_vm2, %v632_v5 }
 0x375   :  { %1054 = vmatmul.msk.f32.gmra.mxu0 %vm372_vm2, %v633_v36 }
 0x37d   :  { %1055 = vmatmul.msk.f32.gmra.mxu0 %vm372_vm2, %v634_v39 }
 0x385   :  { %1056 = vmatmul.msk.f32.gmra.mxu0 %vm372_vm2, %v635_v40  ;;  %v849_v40 = vpop.permute.xlu1 %848 }
 0x38d   :  { %1057 = vmatmul.msk.f32.gmra.mxu0 %vm372_vm2, %v636_v41 }
 0x395   :  { %1058 = vmatmul.msk.f32.gmra.mxu0 %vm372_vm2, %v637_v42 }
 0x39d   :  { %1059 = vmatmul.msk.f32.gmra.mxu0 %vm372_vm2, %v638_v43 }
 0x3a5   :  { %1060 = vmatmul.msk.f32.gmra.mxu0 %vm372_vm2, %v639_v44 }
 0x3d2   :  { %v766_v45 = vpop.f32.mrf.mxu0 }
 0x3d3   :  { %v767_v27 = vadd.f32 %v766_v45, %v656_v20  ;;  %v917_v45 = vpop.permute.xlu0 %916 }
 0x3d5   :  { %v802_v31 = vmax.f32 %v767_v27, 0.0 }
 0x3d8   :  { %v799_v47 = vpop.f32.mrf.mxu3 }
 0x3d9   :  { %v800_v48 = vadd.f32 %v799_v47, %v711_v46 }
 0x3da   :  { %v769_v49 = vpop.f32.mrf.mxu0 }
 0x3db   :  { %v1620_v50 = vmax.f32 %v800_v48, 0.0  ;;  %v770_v23 = vadd.f32 %v769_v49, %v661_v17 }
 0x3dd   :  { %828 = vmatpush.msra.mxu2 %v1620_v50  ;;  %888 = vmatpush.msrb.mxu1 %v1620_v50  ;;  %v803_v24 = vmax.f32 %v770_v23, 0.0 }
 0x3e2   :  { %v772_v51 = vpop.f32.mrf.mxu0 }
 0x3e3   :  { %v773_v29 = vadd.f32 %v772_v51, %v666_v19 }
 0x3e5   :  { %v804_v7 = vmax.f32 %v773_v29, 0.0 }
 0x3ea   :  { %v775_v52 = vpop.f32.mrf.mxu0 }
 0x3eb   :  { %v776_v26 = vadd.f32 %v775_v52, %v671_v13 }
 0x3ed   :  { %v805_v6 = vmax.f32 %v776_v26, 0.0 }
 0x3f2   :  { %v778_v53 = vpop.f32.mrf.mxu0 }
 0x3f3   :  { %v779_v16 = vadd.f32 %v778_v53, %v676_v1 }
 0x3f5   :  { %v806_v30 = vmax.f32 %v779_v16, 0.0 }
 0x3fa   :  { %v781_v54 = vpop.f32.mrf.mxu0 }
 0x3fb   :  { %v782_v22 = vadd.f32 %v781_v54, %v681_v21 }
 0x3fd   :  { %v807_v14 = vmax.f32 %v782_v22, 0.0 }
 0x402   :  { %v784_v55 = vpop.f32.mrf.mxu0 }
 0x403   :  { %v785_v9 = vadd.f32 %v784_v55, %v686_v3 }
 0x405   :  { %v808_v25 = vmax.f32 %v785_v9, 0.0 }
 0x40a   :  { %v787_v56 = vpop.f32.mrf.mxu0 }
 0x40b   :  { %v788_v61 = vadd.f32 %v787_v56, %v691_v0 }
 0x40d   :  { %v809_v10 = vmax.f32 %v788_v61, 0.0  ;;  %v1086_v61 = vld [vmem:[%s1663_s2] ss:$0 sm:$0xff] }
 0x412   :  { %v790_v57 = vpop.f32.mrf.mxu0 }
 0x413   :  { %v791_v15 = vadd.f32 %v790_v57, %v696_v63 }
 0x415   :  { %v810_v2 = vmax.f32 %v791_v15, 0.0 }
 0x41a   :  { %v793_v60 = vpop.f32.mrf.mxu0 }
 0x41b   :  { %v794_v11 = vadd.f32 %v793_v60, %v701_v59 }
 0x41d   :  { %v811_v62 = vmax.f32 %v794_v11, 0.0  ;;  %v875_v11 = vld [vmem:[%s1658_s6 + $0x190] sm:$0x1] }
 0x422   :  { %v796_v8 = vpop.f32.mrf.mxu0 }
 0x423   :  { %v797_v12 = vadd.f32 %v796_v8, %v706_v58 }
 0x425   :  { %v812_v18 = vmax.f32 %v797_v12, 0.0 }
 0x427   :  { %829 = vmatpush.msra.mxu2 %v812_v18  ;;  %889 = vmatpush.msrb.mxu1 %v812_v18 }
 0x429   :  { %830 = vmatpush.msra.mxu2 %v811_v62  ;;  %890 = vmatpush.msrb.mxu1 %v811_v62 }
 0x42b   :  { %831 = vmatpush.msra.mxu2 %v810_v2  ;;  %891 = vmatpush.msrb.mxu1 %v810_v2 }
 0x42d   :  { %832 = vmatpush.msra.mxu2 %v809_v10  ;;  %892 = vmatpush.msrb.mxu1 %v809_v10 }
 0x42f   :  { %833 = vmatpush.msra.mxu2 %v808_v25  ;;  %893 = vmatpush.msrb.mxu1 %v808_v25 }
 0x431   :  { %834 = vmatpush.msra.mxu2 %v807_v14  ;;  %894 = vmatpush.msrb.mxu1 %v807_v14 }
 0x433   :  { %835 = vmatpush.msra.mxu2 %v806_v30  ;;  %895 = vmatpush.msrb.mxu1 %v806_v30 }
 0x435   :  { %836 = vmatpush.msra.mxu2 %v805_v6  ;;  %896 = vmatpush.msrb.mxu1 %v805_v6 }
 0x437   :  { %837 = vmatpush.msra.mxu2 %v804_v7  ;;  %897 = vmatpush.msrb.mxu1 %v804_v7 }
 0x439   :  { %838 = vmatpush.msra.mxu2 %v803_v24  ;;  %898 = vmatpush.msrb.mxu1 %v803_v24 }
 0x43b   :  { %839 = vmatpush.msra.mxu2 %v802_v31  ;;  %899 = vmatpush.msrb.mxu1 %v802_v31 }
 0x43c   :  { %1062 = vmatmul.msk.f32.vlgmr.msra.gmra.mxu2 %vm372_vm2, %v814_v38 }
 0x43d   :  { %858 = vmatpush.msrb.mxu2 %v1620_v50  ;;  %v874_v50 = vld [vmem:[%s1660_s5 + $0x190] sm:$0x1] }
 0x43e   :  { %1064 = vmatmul.msk.f32.vlgmr.msrb.gmra.mxu1 %vm372_vm2, %v874_v50 }
 0x43f   :  { %859 = vmatpush.msrb.mxu2 %v812_v18 }
 0x441   :  { %860 = vmatpush.msrb.mxu2 %v811_v62 }
 0x443   :  { %861 = vmatpush.msrb.mxu2 %v810_v2 }
 0x445   :  { %862 = vmatpush.msrb.mxu2 %v809_v10  ;;  %v1087_v10 = vld [vmem:[%s1664_s1] ss:$0 sm:$0xff] }
 0x447   :  { %863 = vmatpush.msrb.mxu2 %v808_v25 }
 0x449   :  { %864 = vmatpush.msrb.mxu2 %v807_v14 }
 0x44b   :  { %865 = vmatpush.msrb.mxu2 %v806_v30 }
 0x44d   :  { %866 = vmatpush.msrb.mxu2 %v805_v6 }
 0x44f   :  { %867 = vmatpush.msrb.mxu2 %v804_v7 }
 0x451   :  { %868 = vmatpush.msrb.mxu2 %v803_v24 }
 0x453   :  { %869 = vmatpush.msrb.mxu2 %v802_v31 }
 0x454   :  { %1063 = vmatmul.msk.f32.vlgmr.msrb.gmra.mxu2 %vm372_vm2, %v844_v28 }
 0x4bb   :  { %v901_v26 = vpop.f32.mrf.mxu1 }
 0x4bf   :  { %v841_v34 = vpop.f32.mrf.mxu2 }
 0x4c0   :  { %v842_v4 = vadd.f32 %v841_v34, %v819_v32 }
 0x4c2   :  { %v911_v5 = vmul.f32 %v909_v35, %v842_v4 }
 0x4c4   :  { %v975_v36 = vsel %vm972_vm3, %v911_v5, -inf  ;;  %v928_v39 = vsel %vm926_vm4, %v911_v5, -inf }
 0x4c5   :  { %976 = vmax.xlane.f32.xlu2 %v975_v36  ;;  %929 = vmax.xlane.f32.xlu1 %v928_v39 }
 0x4d7   :  { %v871_v41 = vpop.f32.mrf.mxu2 }
 0x4d8   :  { %v872_v42 = vadd.f32 %v871_v41, %v849_v40 }
 0x4da   :  { %v912_v43 = vmul.f32 %v909_v35, %v872_v42 }
 0x4dc   :  { %v913_v44 = vsub.f32 %v912_v43, %v911_v5 }
 0x4de   :  { %v919_v46 = vmul.f32 %v917_v45, %v913_v44 }
 0x4e0   :  { %v920_v47 = vadd.f32 %v919_v46, %v911_v5 }
 0x4e2   :  { %v991_v48 = vsel %vm972_vm3, %v920_v47, -inf  ;;  %v950_v49 = vsel %vm926_vm4, %v920_v47, -inf }
 0x4e3   :  { %992 = vmax.xlane.f32.xlu2 %v991_v48  ;;  %951 = vmax.xlane.f32.xlu0 %v950_v49 }
 0x538   :  { %v977_v51 = vpop.xlane.xlu2 %976  ;;  %v930_v52 = vpop.xlane.xlu1 %929 }
 0x539   :  { %v978_v53 = vsub.f32 %v975_v36, %v977_v51  ;;  %v931_v54 = vsub.f32 %v928_v39, %v930_v52 }
 0x53b   :  { %v979_v55 = vmul.f32 1.442695, %v978_v53  ;;  %v932_v56 = vmul.f32 1.442695, %v931_v54 }
 0x53d   :  { %1088 = vpow2.f32 %v979_v55 }
 0x53e   :  { %1090 = vpow2.f32 %v932_v56 }
 0x543   :  { %v1089_v57 = vpop.eup %1088 }
 0x544   :  { %v1091_v58 = vpop.eup %1090  ;;  %981 = vadd.xlane.f32.xlu2 %v1089_v57 }
 0x545   :  { %934 = vadd.xlane.f32.xlu1 %v1091_v58 }
 0x556   :  { %v993_v59 = vpop.xlane.xlu2 %992  ;;  %v952_v60 = vpop.xlane.xlu0 %951 }
 0x557   :  { %v994_v63 = vsub.f32 %v991_v48, %v993_v59  ;;  %v953_v0 = vsub.f32 %v950_v49, %v952_v60 }
 0x559   :  { %v995_v3 = vmul.f32 1.442695, %v994_v63  ;;  %v954_v8 = vmul.f32 1.442695, %v953_v0 }
 0x55b   :  { %1092 = vpow2.f32 %v995_v3 }
 0x55c   :  { %1094 = vpow2.f32 %v954_v8  ;;  %878 = vperm.xlu2 %1085, %v875_v11  }
 0x561   :  { %v1093_v12 = vpop.eup %1092 }
 0x562   :  { %v1095_v15 = vpop.eup %1094  ;;  %997 = vadd.xlane.f32.xlu1 %v1093_v12 }
 0x563   :  { %956 = vadd.xlane.f32.xlu0 %v1095_v15 }
 0x5b7   :  { %v982_v18 = vpop.xlane.xlu2 %981 }
 0x5b8   :  { %v935_v21 = vpop.xlane.xlu1 %934  ;;  %1096 = vrcp.f32 %v982_v18 }
 0x5b9   :  { %1098 = vrcp.f32 %v935_v21 }
 0x5be   :  { %v1097_v62 = vpop.eup %1096 }
 0x5bf   :  { %v1099_v1 = vpop.eup %1098  ;;  %v984_v9 = vmul.f32 %v1097_v62, %v1089_v57  ;;  %v879_v19 = vpop.permute.xlu2 %878 }
 0x5c0   :  { %v937_v2 = vmul.f32 %v1099_v1, %v1091_v58  ;;  %v902_v30 = vadd.f32 %v901_v26, %v879_v19 }
 0x5c1   :  { %v988_v13 = vmul.f32 %v1086_v61, %v984_v9  ;;  %v985_v16 = vmul.f32 %v1087_v10, %v984_v9 }
 0x5c2   :  { %v947_v22 = vmul.f32 %v1086_v61, %v937_v2  ;;  %v941_v25 = vmul.f32 %v1087_v10, %v937_v2  ;;  %v960_v6 = vperm.slane %v902_v30, 0 }
 0x5c3   :  { %989 = vadd.xlane.f32.xlu1 %v988_v13 }
 0x5c4   :  { %948 = vadd.xlane.f32.xlu0 %v947_v22 }
 0x5cb   :  { %986 = vadd.xlane.f32.xlu1 %v985_v16 }
 0x5cc   :  { %942 = vadd.xlane.f32.xlu0 %v941_v25 }
 0x5d5   :  { %v998_v14 = vpop.xlane.xlu1 %997 }
 0x5d6   :  { %1100 = vrcp.f32 %v998_v14  ;;  %v957_v29 = vpop.xlane.xlu0 %956 }
 0x5d7   :  { %1102 = vrcp.f32 %v957_v29 }
 0x5dc   :  { %v1101_v17 = vpop.eup %1100 }
 0x5dd   :  { %v1103_v23 = vpop.eup %1102  ;;  %v1000_v20 = vmul.f32 %v1101_v17, %v1093_v12 }
 0x5de   :  { %v959_v27 = vmul.f32 %v1103_v23, %v1095_v15 }
 0x5df   :  { %v1001_v7 = vmul.f32 %v1000_v20, %v960_v6 }
 0x5e0   :  { %v961_v24 = vmul.f32 %v960_v6, %v959_v27 }
 0x5e1   :  { %1002 = vadd.xlane.f32.xlu1 %v1001_v7 }
 0x5e2   :  { %962 = vadd.xlane.f32.xlu0 %v961_v24 }
 0x636   :  { %v990_v31 = vpop.xlane.xlu1 %989 }
 0x637   :  { %v949_v38 = vpop.xlane.xlu0 %948  ;;  %v1005_v32 = vmul.f32 2.0, %v990_v31 }
 0x638   :  { %v967_v34 = vmul.f32 2.0, %v949_v38 }
 0x63e   :  { %v987_v28 = vpop.xlane.xlu1 %986 }
 0x63f   :  { %v943_v33 = vpop.xlane.xlu0 %942  ;;  %v1004_v4 = vmul.f32 2.0, %v987_v28 }
 0x640   :  { %v965_v5 = vmul.f32 2.0, %v943_v33 }
 0x654   :  { %v1003_v35 = vpop.xlane.xlu1 %1002 }
 0x655   :  { %v1006_v36 = vsel %vm966_vm5, %v1005_v32, %v1003_v35  ;;  %v963_v39 = vpop.xlane.xlu0 %962 }
 0x656   :  { %v1007_v40 = vsel %vm964_vm6, %v1004_v4, %v1006_v36  ;;  %v968_v41 = vsel %vm966_vm5, %v967_v34, %v963_v39 }
 0x657   :  { %1065 = vst.msk [vmem:[%s1665_s7 + $0x8] sm:$0xff] %vm970_vm7, %v1007_v40  ;;  %v969_v42 = vsel %vm964_vm6, %v965_v5, %v968_v41 }
 0x658   :  { %971 = vst.msk [vmem:[%s1665_s7] sm:$0xff] %vm970_vm7, %v969_v42 }

</bundles_post_ra>
